<compile_context>
chip_gen: v7x
topology: tpu7x:2x2x1
jax: 0.10.0
libtpu: 0.0.40
codegen_flags: <defaults>
</compile_context>

<pallas_src>
import math

import numpy as np
import jax
import jax.numpy as jnp
from jax import lax
from jax.experimental import pallas as pl
from jax.experimental.pallas import tpu as pltpu


def _softmax(x, axis):
    """Max-shifted softmax; denominator via the EUP approximate reciprocal."""
    m = jnp.max(x, axis=axis, keepdims=True)
    e = jnp.exp(x - m)
    return e * pl.reciprocal(jnp.sum(e, axis=axis, keepdims=True), approx=True)


def esa_loss_kernel(stu_len_ref, tea_len_ref, tgt_len_ref,    # scalar prefetch (SMEM)
                    stu_slf_ref,                               # (A_blk, Ls, Ls)
                    tea_slf_ref,                               # (A_blk, Lt, Lt)
                    stu_dec_ref,                               # (A_blk, Ls, T)  (pre-transposed)
                    tea_dec_ref,                               # (A_blk, T,  Lt)
                    out_ref):                                  # (1, 1) partial loss
    b = pl.program_id(0)

    s_len = stu_len_ref[b]   # student encoder valid length
    t_len = tea_len_ref[b]   # teacher encoder valid length
    g_len = tgt_len_ref[b]   # target (decoder) valid length

    a_blk, Ls, T = stu_dec_ref.shape
    Lt = tea_slf_ref.shape[-1]
    mxu_dtype = stu_slf_ref.dtype    # keep MXU operands in the caller's dtype

    # ---- masks: hoisted out of the head loop (head independent) -------------
    row_ls = lax.broadcasted_iota(jnp.int32, (Ls, 1), 0) < s_len
    row_t = lax.broadcasted_iota(jnp.int32, (T, 1), 0) < g_len
    row_lt = lax.broadcasted_iota(jnp.int32, (Lt, 1), 0) < t_len
    col_t = lax.broadcasted_iota(jnp.int32, (1, T), 1) < g_len
    col_lt = lax.broadcasted_iota(jnp.int32, (1, Lt), 1) < t_len

    keep_sd = jnp.logical_and(row_ls, col_t)     # (Ls, T)
    keep_td = jnp.logical_and(row_t, col_lt)     # (T,  Lt)
    keep_tr = jnp.logical_and(row_ls, col_lt)    # (Ls, Lt)
    keep_ts = jnp.logical_and(row_lt, col_lt)    # (Lt, Lt)

    def head_body(h, acc):
        # One head at a time keeps the live f32 working set tiny (no spills).
        # --- student dec-enc: already transposed to (Ls, T); softmax over T ---
        sd = _softmax(stu_dec_ref[h].astype(jnp.float32), axis=-1)
        sd = jnp.where(keep_sd, sd, 0.0)
        # --- teacher dec-enc: (T, Lt); softmax over T (rows) -------------------
        td = _softmax(tea_dec_ref[h].astype(jnp.float32), axis=0)
        td = jnp.where(keep_td, td, 0.0)

        # transformation[l, c] = sum_t sd[l, t] * td[t, c]  -> (Ls, Lt)
        trans = jnp.dot(sd.astype(mxu_dtype), td.astype(mxu_dtype),
                        preferred_element_type=jnp.float32)

        # Shared exp for both softmaxes of `trans` (shift-invariant; trans is
        # bounded in [0, 1] so a single global shift is numerically safe).
        e = jnp.exp(trans - jnp.max(trans))
        stu_trans = jnp.where(
            keep_tr,
            e * pl.reciprocal(jnp.sum(e, axis=0, keepdims=True), approx=True),
            0.0)                                                   # softmax over Ls
        tea_trans = jnp.where(
            keep_tr,
            e * pl.reciprocal(jnp.sum(e, axis=1, keepdims=True), approx=True),
            0.0)                                                   # softmax over Lt

        # --- student side prediction: raw stu_enc_slf stays in caller dtype ---
        pred = jnp.dot(stu_slf_ref[h], stu_trans.astype(mxu_dtype),
                       preferred_element_type=jnp.float32)         # (Ls, Lt)

        # --- teacher side target ----------------------------------------------
        ts = _softmax(tea_slf_ref[h].astype(jnp.float32), axis=0)  # softmax over rows
        ts = jnp.where(keep_ts, ts, 0.0)
        target = jnp.dot(tea_trans.astype(mxu_dtype), ts.astype(mxu_dtype),
                         preferred_element_type=jnp.float32)       # (Ls, Lt)

        diff = pred - target
        return acc + jnp.sum(diff * diff)

    acc = lax.fori_loop(0, a_blk, head_body, jnp.float32(0.0), unroll=True)
    # Per-(batch, head-block) partial of MSE(reduction='sum'); summed outside.
    out_ref[...] = jnp.full((1, 1), acc, jnp.float32)


def _vmem_budget_bytes():
    """~80% of this generation's per-core VMEM (headroom for compiler scratch)."""
    try:
        cap = int(pltpu.get_tpu_info().vmem_capacity_bytes)
    except Exception:
        cap = 64 << 20     # conservative default: v7x per-TC physical VMEM
    return int(cap * 0.8)


def esa_loss_pallas(stu_enc_slf, tea_enc_slf, stu_dec_enc, tea_dec_enc,
                    cer, wer, stu_input_len, tea_input_len, target_len,
                    *, ratio, using_cer=True):
    B, A, Lt, _ = tea_enc_slf.shape
    T = tea_dec_enc.shape[2]
    Ls = stu_enc_slf.shape[1]

    # Glue: the .view(batch, attn_nums, ...) reshapes and the .transpose(2, 3)
    # from the PyTorch code (done outside the kernel so every in-kernel matmul
    # is a standard, non-transposed 2-D dot).  No dtype casts here -- the
    # kernel casts after the (narrow) DMA.
    stu_slf4 = jnp.reshape(stu_enc_slf, (B, A, Ls, Ls))
    stu_dec4t = jnp.swapaxes(jnp.reshape(stu_dec_enc, (B, A, T, Ls)), 2, 3)  # (B,A,Ls,T)

    stu_len = jnp.asarray(stu_input_len, jnp.int32)
    tea_len = jnp.asarray(tea_input_len, jnp.int32)
    tgt_len = jnp.asarray(target_len, jnp.int32)

    # ---- generation-aware VMEM budget & heads-per-block selection ------------
    in_itemsize = max(jnp.dtype(x.dtype).itemsize
                      for x in (stu_enc_slf, tea_enc_slf, stu_dec_enc, tea_dec_enc))
    per_head_in = (Ls * Ls + Lt * Lt + T * Ls + T * Lt) * in_itemsize
    # Only one head's f32 intermediates are live at a time inside the fori_loop.
    head_work_f32 = (Ls * T + T * Lt + Ls * Ls + Lt * Lt + 8 * Ls * Lt) * 4
    margin = 2 << 20

    vmem_budget = _vmem_budget_bytes()
    a_blk = 1
    for cand in range(A, 0, -1):
        if A % cand == 0 and (2 * cand * per_head_in + head_work_f32 + margin) <= vmem_budget:
            a_blk = cand
            break
    ag = A // a_blk

    need = 2 * a_blk * per_head_in + head_work_f32 + margin
    vmem_limit = int(min(vmem_budget, max(32 << 20, need)))

    grid_spec = pltpu.PrefetchScalarGridSpec(
        num_scalar_prefetch=3,
        grid=(B, ag),
        in_specs=[
            pl.BlockSpec((None, a_blk, Ls, Ls), lambda b, a, *_: (b, a, 0, 0)),
            pl.BlockSpec((None, a_blk, Lt, Lt), lambda b, a, *_: (b, a, 0, 0)),
            pl.BlockSpec((None, a_blk, Ls, T), lambda b, a, *_: (b, a, 0, 0)),
            pl.BlockSpec((None, a_blk, T, Lt), lambda b, a, *_: (b, a, 0, 0)),
        ],
        # Independent (1,1) partial per grid step: race-free under megacore.
        out_specs=pl.BlockSpec((None, None, 1, 1), lambda b, a, *_: (b, a, 0, 0)),
    )

    partials = pl.pallas_call(
        esa_loss_kernel,
        out_shape=jax.ShapeDtypeStruct((B, ag, 1, 1), jnp.float32),
        grid_spec=grid_spec,
        compiler_params=pltpu.CompilerParams(
            dimension_semantics=("parallel", "parallel"),
            vmem_limit_bytes=vmem_limit),
    )(stu_len, tea_len, tgt_len, stu_slf4, tea_enc_slf, stu_dec4t, tea_dec_enc)

    loss = jnp.sum(partials)

    # beta is a host-side scalar in the PyTorch code (np.exp on a python float).
    err = cer if using_cer else wer
    beta = math.exp(-ratio * err)
    return beta * loss


def esa_loss_ref(stu_enc_slf, tea_enc_slf, stu_dec_enc, tea_dec_enc,
                 cer, wer, stu_input_len, tea_input_len, target_len,
                 *, ratio, using_cer=True):
    """Pure-JAX reference mirroring the PyTorch forward exactly."""
    B, A, Lt, _ = tea_enc_slf.shape
    T = tea_dec_enc.shape[2]
    Ls = stu_enc_slf.shape[1]
    stu_slf = stu_enc_slf.reshape(B, A, Ls, Ls).astype(jnp.float32)
    stu_dec = stu_dec_enc.reshape(B, A, T, Ls).astype(jnp.float32)
    tea_slf = tea_enc_slf.astype(jnp.float32)
    tea_dec = tea_dec_enc.astype(jnp.float32)

    s_len = jnp.asarray(stu_input_len)[:, None, None, None]
    t_len = jnp.asarray(tea_input_len)[:, None, None, None]
    g_len = jnp.asarray(target_len)[:, None, None, None]

    def keep(shape, row_lim, col_lim):
        r = lax.broadcasted_iota(jnp.int32, (1, 1) + shape, 2)
        c = lax.broadcasted_iota(jnp.int32, (1, 1) + shape, 3)
        return (r < row_lim) & (c < col_lim)

    sd = jnp.swapaxes(stu_dec, 2, 3)                               # (B,A,Ls,T)
    sd = jax.nn.softmax(sd, axis=-1) * keep((Ls, T), s_len, g_len)
    td = jax.nn.softmax(tea_dec, axis=2) * keep((T, Lt), g_len, t_len)
    trans = jnp.einsum("balt,batc->balc", sd, td)
    tr_keep = keep((Ls, Lt), s_len, t_len)
    stu_trans = jax.nn.softmax(trans, axis=2) * tr_keep
    pred = jnp.einsum("balk,bakc->balc", stu_slf, stu_trans)
    tea_trans = jax.nn.softmax(trans, axis=-1) * tr_keep
    ts = jax.nn.softmax(tea_slf, axis=2) * keep((Lt, Lt), t_len, t_len)
    target = jnp.einsum("balk,bakc->balc", tea_trans, ts)
    loss = jnp.sum((pred - target) ** 2)
    err = cer if using_cer else wer
    return math.exp(-ratio * err) * loss


if __name__ == "__main__":
    # small shapes: B=2 batch, A=4 heads, Ls=16 student enc len,
    # Lt=16 teacher enc len, T=8 target (decoder) len
    B, A, Ls, Lt, T = 2, 4, 16, 16, 8
    ratio, cer, wer = 2.0, 0.3, 0.45

    key = jax.random.PRNGKey(0)
    k1, k2, k3, k4 = jax.random.split(key, 4)
    stu_enc_slf = jax.random.normal(k1, (B * A, Ls, Ls), jnp.float32)
    tea_enc_slf = jax.random.normal(k2, (B, A, Lt, Lt), jnp.float32)
    stu_dec_enc = jax.random.normal(k3, (B * A, T, Ls), jnp.float32)
    tea_dec_enc = jax.random.normal(k4, (B, A, T, Lt), jnp.float32)

    stu_input_len = [12, 16]
    tea_input_len = [10, 16]
    target_len = [5, 8]

    out = esa_loss_pallas(stu_enc_slf, tea_enc_slf, stu_dec_enc, tea_dec_enc,
                          cer, wer, stu_input_len, tea_input_len, target_len,
                          ratio=ratio, using_cer=True)
    out = jax.block_until_ready(out)

    ref = jax.block_until_ready(
        esa_loss_ref(stu_enc_slf, tea_enc_slf, stu_dec_enc, tea_dec_enc,
                     cer, wer, stu_input_len, tea_input_len, target_len,
                     ratio=ratio, using_cer=True))

    np.testing.assert_allclose(np.asarray(out), np.asarray(ref),
                               rtol=1e-2, atol=1e-2)
    print("KERNEL_OK")
</pallas_src>

<mosaic_0001>
module attributes {stable_mosaic.version = 11 : i64} {
  func.func @esa_loss_kernel(%arg0: i32, %arg1: i32, %arg2: memref<2xi32, #tpu.memory_space<smem>>, %arg3: memref<2xi32, #tpu.memory_space<smem>>, %arg4: memref<2xi32, #tpu.memory_space<smem>>, %arg5: memref<1x4x16x16xf32, #tpu.memory_space<vmem>>, %arg6: memref<1x4x16x16xf32, #tpu.memory_space<vmem>>, %arg7: memref<1x4x16x8xf32, #tpu.memory_space<vmem>>, %arg8: memref<1x4x8x16xf32, #tpu.memory_space<vmem>>, %arg9: memref<1x1x1x1xf32, #tpu.memory_space<vmem>>) attributes {dimension_semantics = [#tpu.dimension_semantics<parallel>, #tpu.dimension_semantics<parallel>], iteration_bounds = array<i64: 2, 1>, scalar_prefetch = 3 : i64, scratch_operands = 0 : i64, tpu.core_type = #tpu.core_type<tc>, window_params = [{transform_indices = @transform_0, window_bounds = array<i64: 1, 4, 16, 16>}, {transform_indices = @transform_1, window_bounds = array<i64: 1, 4, 16, 16>}, {transform_indices = @transform_2, window_bounds = array<i64: 1, 4, 16, 8>}, {transform_indices = @transform_3, window_bounds = array<i64: 1, 4, 8, 16>}, {transform_indices = @transform_4, window_bounds = array<i64: 1, 1, 1, 1>}]} {
    %0 = arith.index_cast %arg0 : i32 to index
    %1 = memref.load %arg2[%0] : memref<2xi32, #tpu.memory_space<smem>>
    %2 = arith.index_cast %arg0 : i32 to index
    %3 = memref.load %arg3[%2] : memref<2xi32, #tpu.memory_space<smem>>
    %4 = arith.index_cast %arg0 : i32 to index
    %5 = memref.load %arg4[%4] : memref<2xi32, #tpu.memory_space<smem>>
    %6 = tpu.iota {dimensions = array<i32: 0>} : vector<16x1xi32>
    %7 = vector.broadcast %1 : i32 to vector<16x1xi32>
    %8 = arith.cmpi slt, %6, %7 : vector<16x1xi32>
    %9 = tpu.iota {dimensions = array<i32: 0>} : vector<8x1xi32>
    %10 = vector.broadcast %5 : i32 to vector<8x1xi32>
    %11 = arith.cmpi slt, %9, %10 : vector<8x1xi32>
    %12 = tpu.iota {dimensions = array<i32: 0>} : vector<16x1xi32>
    %13 = vector.broadcast %3 : i32 to vector<16x1xi32>
    %14 = arith.cmpi slt, %12, %13 : vector<16x1xi32>
    %15 = tpu.iota {dimensions = array<i32: 1>} : vector<1x8xi32>
    %16 = vector.broadcast %5 : i32 to vector<1x8xi32>
    %17 = arith.cmpi slt, %15, %16 : vector<1x8xi32>
    %18 = tpu.iota {dimensions = array<i32: 1>} : vector<1x16xi32>
    %19 = vector.broadcast %3 : i32 to vector<1x16xi32>
    %20 = arith.cmpi slt, %18, %19 : vector<1x16xi32>
    %21 = vector.broadcast %8 : vector<16x1xi1> to vector<16x8xi1>
    %22 = vector.broadcast %17 : vector<1x8xi1> to vector<16x8xi1>
    %23 = arith.andi %21, %22 : vector<16x8xi1>
    %24 = vector.broadcast %11 : vector<8x1xi1> to vector<8x16xi1>
    %25 = vector.broadcast %20 : vector<1x16xi1> to vector<8x16xi1>
    %26 = arith.andi %24, %25 : vector<8x16xi1>
    %27 = vector.broadcast %8 : vector<16x1xi1> to vector<16x16xi1>
    %28 = vector.broadcast %20 : vector<1x16xi1> to vector<16x16xi1>
    %29 = arith.andi %27, %28 : vector<16x16xi1>
    %30 = vector.broadcast %14 : vector<16x1xi1> to vector<16x16xi1>
    %31 = vector.broadcast %20 : vector<1x16xi1> to vector<16x16xi1>
    %32 = arith.andi %30, %31 : vector<16x16xi1>
    %cst = arith.constant 0.000000e+00 : f32
    %c0_i32 = arith.constant 0 : i32
    %c0 = arith.constant 0 : index
    %33 = arith.index_cast %c0_i32 : i32 to index
    %c0_0 = arith.constant 0 : index
    %c0_1 = arith.constant 0 : index
    %34 = vector.load %arg7[%c0, %33, %c0_0, %c0_1] : memref<1x4x16x8xf32, #tpu.memory_space<vmem>>, vector<1x1x16x8xf32>
    %35 = vector.shape_cast %34 : vector<1x1x16x8xf32> to vector<16x8xf32>
    %cst_2 = arith.constant dense<0xFF800000> : vector<16xf32>
    %36 = vector.multi_reduction <maximumf>, %35, %cst_2 [1] : vector<16x8xf32> to vector<16xf32>
    %37 = vector.shape_cast %36 : vector<16xf32> to vector<16x1xf32>
    %38 = vector.broadcast %37 : vector<16x1xf32> to vector<16x8xf32>
    %39 = arith.subf %35, %38 : vector<16x8xf32>
    %40 = math.exp %39 : vector<16x8xf32>
    %cst_3 = arith.constant dense<0.000000e+00> : vector<16xf32>
    %41 = vector.multi_reduction <add>, %40, %cst_3 [1] : vector<16x8xf32> to vector<16xf32>
    %42 = vector.shape_cast %41 : vector<16xf32> to vector<16x1xf32>
    %43 = tpu.reciprocal %42 {approx = true} : vector<16x1xf32> -> vector<16x1xf32>
    %44 = vector.broadcast %43 : vector<16x1xf32> to vector<16x8xf32>
    %45 = arith.mulf %40, %44 : vector<16x8xf32>
    %cst_4 = arith.constant 0.000000e+00 : f32
    %46 = vector.broadcast %cst_4 : f32 to vector<16x8xf32>
    %47 = arith.select %23, %45, %46 : vector<16x8xi1>, vector<16x8xf32>
    %c0_5 = arith.constant 0 : index
    %48 = arith.index_cast %c0_i32 : i32 to index
    %c0_6 = arith.constant 0 : index
    %c0_7 = arith.constant 0 : index
    %49 = vector.load %arg8[%c0_5, %48, %c0_6, %c0_7] : memref<1x4x8x16xf32, #tpu.memory_space<vmem>>, vector<1x1x8x16xf32>
    %50 = vector.shape_cast %49 : vector<1x1x8x16xf32> to vector<8x16xf32>
    %cst_8 = arith.constant dense<0xFF800000> : vector<16xf32>
    %51 = vector.multi_reduction <maximumf>, %50, %cst_8 [0] : vector<8x16xf32> to vector<16xf32>
    %52 = vector.shape_cast %51 : vector<16xf32> to vector<1x16xf32>
    %53 = vector.broadcast %52 : vector<1x16xf32> to vector<8x16xf32>
    %54 = arith.subf %50, %53 : vector<8x16xf32>
    %55 = math.exp %54 : vector<8x16xf32>
    %cst_9 = arith.constant dense<0.000000e+00> : vector<16xf32>
    %56 = vector.multi_reduction <add>, %55, %cst_9 [0] : vector<8x16xf32> to vector<16xf32>
    %57 = vector.shape_cast %56 : vector<16xf32> to vector<1x16xf32>
    %58 = tpu.reciprocal %57 {approx = true} : vector<1x16xf32> -> vector<1x16xf32>
    %59 = vector.broadcast %58 : vector<1x16xf32> to vector<8x16xf32>
    %60 = arith.mulf %55, %59 : vector<8x16xf32>
    %cst_10 = arith.constant 0.000000e+00 : f32
    %61 = vector.broadcast %cst_10 : f32 to vector<8x16xf32>
    %62 = arith.select %26, %60, %61 : vector<8x16xi1>, vector<8x16xf32>
    %cst_11 = arith.constant dense<0.000000e+00> : vector<16x16xf32>
    %63 = tpu.matmul %47, %62, %cst_11 {dimension_numbers = #tpu.dot_dimension_numbers<[1], [0], [0], [1], [0, 0, 1, 1], [], []>} : vector<16x8xf32>, vector<8x16xf32>, vector<16x16xf32> -> vector<16x16xf32>
    %64 = vector.shape_cast %63 : vector<16x16xf32> to vector<1x16x16xf32>
    %cst_12 = arith.constant dense<0xFF800000> : vector<1xf32>
    %65 = vector.multi_reduction <maximumf>, %64, %cst_12 [1, 2] : vector<1x16x16xf32> to vector<1xf32>
    %66 = vector.shape_cast %65 : vector<1xf32> to vector<1x1x1xf32>
    %67 = vector.extract %66[0, 0, 0] : f32 from vector<1x1x1xf32>
    %68 = vector.broadcast %67 : f32 to vector<16x16xf32>
    %69 = arith.subf %63, %68 : vector<16x16xf32>
    %70 = math.exp %69 : vector<16x16xf32>
    %cst_13 = arith.constant dense<0.000000e+00> : vector<16xf32>
    %71 = vector.multi_reduction <add>, %70, %cst_13 [0] : vector<16x16xf32> to vector<16xf32>
    %72 = vector.shape_cast %71 : vector<16xf32> to vector<1x16xf32>
    %73 = tpu.reciprocal %72 {approx = true} : vector<1x16xf32> -> vector<1x16xf32>
    %74 = vector.broadcast %73 : vector<1x16xf32> to vector<16x16xf32>
    %75 = arith.mulf %70, %74 : vector<16x16xf32>
    %cst_14 = arith.constant 0.000000e+00 : f32
    %76 = vector.broadcast %cst_14 : f32 to vector<16x16xf32>
    %77 = arith.select %29, %75, %76 : vector<16x16xi1>, vector<16x16xf32>
    %cst_15 = arith.constant dense<0.000000e+00> : vector<16xf32>
    %78 = vector.multi_reduction <add>, %70, %cst_15 [1] : vector<16x16xf32> to vector<16xf32>
    %79 = vector.shape_cast %78 : vector<16xf32> to vector<16x1xf32>
    %80 = tpu.reciprocal %79 {approx = true} : vector<16x1xf32> -> vector<16x1xf32>
    %81 = vector.broadcast %80 : vector<16x1xf32> to vector<16x16xf32>
    %82 = arith.mulf %70, %81 : vector<16x16xf32>
    %cst_16 = arith.constant 0.000000e+00 : f32
    %83 = vector.broadcast %cst_16 : f32 to vector<16x16xf32>
    %84 = arith.select %29, %82, %83 : vector<16x16xi1>, vector<16x16xf32>
    %c0_17 = arith.constant 0 : index
    %85 = arith.index_cast %c0_i32 : i32 to index
    %c0_18 = arith.constant 0 : index
    %c0_19 = arith.constant 0 : index
    %86 = vector.load %arg5[%c0_17, %85, %c0_18, %c0_19] : memref<1x4x16x16xf32, #tpu.memory_space<vmem>>, vector<1x1x16x16xf32>
    %87 = vector.shape_cast %86 : vector<1x1x16x16xf32> to vector<16x16xf32>
    %cst_20 = arith.constant dense<0.000000e+00> : vector<16x16xf32>
    %88 = tpu.matmul %87, %77, %cst_20 {dimension_numbers = #tpu.dot_dimension_numbers<[1], [0], [0], [1], [0, 0, 1, 1], [], []>} : vector<16x16xf32>, vector<16x16xf32>, vector<16x16xf32> -> vector<16x16xf32>
    %c0_21 = arith.constant 0 : index
    %89 = arith.index_cast %c0_i32 : i32 to index
    %c0_22 = arith.constant 0 : index
    %c0_23 = arith.constant 0 : index
    %90 = vector.load %arg6[%c0_21, %89, %c0_22, %c0_23] : memref<1x4x16x16xf32, #tpu.memory_space<vmem>>, vector<1x1x16x16xf32>
    %91 = vector.shape_cast %90 : vector<1x1x16x16xf32> to vector<16x16xf32>
    %cst_24 = arith.constant dense<0xFF800000> : vector<16xf32>
    %92 = vector.multi_reduction <maximumf>, %91, %cst_24 [0] : vector<16x16xf32> to vector<16xf32>
    %93 = vector.shape_cast %92 : vector<16xf32> to vector<1x16xf32>
    %94 = vector.broadcast %93 : vector<1x16xf32> to vector<16x16xf32>
    %95 = arith.subf %91, %94 : vector<16x16xf32>
    %96 = math.exp %95 : vector<16x16xf32>
    %cst_25 = arith.constant dense<0.000000e+00> : vector<16xf32>
    %97 = vector.multi_reduction <add>, %96, %cst_25 [0] : vector<16x16xf32> to vector<16xf32>
    %98 = vector.shape_cast %97 : vector<16xf32> to vector<1x16xf32>
    %99 = tpu.reciprocal %98 {approx = true} : vector<1x16xf32> -> vector<1x16xf32>
    %100 = vector.broadcast %99 : vector<1x16xf32> to vector<16x16xf32>
    %101 = arith.mulf %96, %100 : vector<16x16xf32>
    %cst_26 = arith.constant 0.000000e+00 : f32
    %102 = vector.broadcast %cst_26 : f32 to vector<16x16xf32>
    %103 = arith.select %32, %101, %102 : vector<16x16xi1>, vector<16x16xf32>
    %cst_27 = arith.constant dense<0.000000e+00> : vector<16x16xf32>
    %104 = tpu.matmul %84, %103, %cst_27 {dimension_numbers = #tpu.dot_dimension_numbers<[1], [0], [0], [1], [0, 0, 1, 1], [], []>} : vector<16x16xf32>, vector<16x16xf32>, vector<16x16xf32> -> vector<16x16xf32>
    %105 = arith.subf %88, %104 : vector<16x16xf32>
    %106 = arith.mulf %105, %105 : vector<16x16xf32>
    %107 = vector.shape_cast %106 : vector<16x16xf32> to vector<1x16x16xf32>
    %cst_28 = arith.constant dense<0.000000e+00> : vector<1xf32>
    %108 = vector.multi_reduction <add>, %107, %cst_28 [1, 2] : vector<1x16x16xf32> to vector<1xf32>
    %109 = vector.shape_cast %108 : vector<1xf32> to vector<1x1x1xf32>
    %110 = vector.extract %109[0, 0, 0] : f32 from vector<1x1x1xf32>
    %111 = arith.addf %cst, %110 : f32
    %c1_i32 = arith.constant 1 : i32
    %c0_29 = arith.constant 0 : index
    %112 = arith.index_cast %c1_i32 : i32 to index
    %c0_30 = arith.constant 0 : index
    %c0_31 = arith.constant 0 : index
    %113 = vector.load %arg7[%c0_29, %112, %c0_30, %c0_31] : memref<1x4x16x8xf32, #tpu.memory_space<vmem>>, vector<1x1x16x8xf32>
    %114 = vector.shape_cast %113 : vector<1x1x16x8xf32> to vector<16x8xf32>
    %cst_32 = arith.constant dense<0xFF800000> : vector<16xf32>
    %115 = vector.multi_reduction <maximumf>, %114, %cst_32 [1] : vector<16x8xf32> to vector<16xf32>
    %116 = vector.shape_cast %115 : vector<16xf32> to vector<16x1xf32>
    %117 = vector.broadcast %116 : vector<16x1xf32> to vector<16x8xf32>
    %118 = arith.subf %114, %117 : vector<16x8xf32>
    %119 = math.exp %118 : vector<16x8xf32>
    %cst_33 = arith.constant dense<0.000000e+00> : vector<16xf32>
    %120 = vector.multi_reduction <add>, %119, %cst_33 [1] : vector<16x8xf32> to vector<16xf32>
    %121 = vector.shape_cast %120 : vector<16xf32> to vector<16x1xf32>
    %122 = tpu.reciprocal %121 {approx = true} : vector<16x1xf32> -> vector<16x1xf32>
    %123 = vector.broadcast %122 : vector<16x1xf32> to vector<16x8xf32>
    %124 = arith.mulf %119, %123 : vector<16x8xf32>
    %cst_34 = arith.constant 0.000000e+00 : f32
    %125 = vector.broadcast %cst_34 : f32 to vector<16x8xf32>
    %126 = arith.select %23, %124, %125 : vector<16x8xi1>, vector<16x8xf32>
    %c0_35 = arith.constant 0 : index
    %127 = arith.index_cast %c1_i32 : i32 to index
    %c0_36 = arith.constant 0 : index
    %c0_37 = arith.constant 0 : index
    %128 = vector.load %arg8[%c0_35, %127, %c0_36, %c0_37] : memref<1x4x8x16xf32, #tpu.memory_space<vmem>>, vector<1x1x8x16xf32>
    %129 = vector.shape_cast %128 : vector<1x1x8x16xf32> to vector<8x16xf32>
    %cst_38 = arith.constant dense<0xFF800000> : vector<16xf32>
    %130 = vector.multi_reduction <maximumf>, %129, %cst_38 [0] : vector<8x16xf32> to vector<16xf32>
    %131 = vector.shape_cast %130 : vector<16xf32> to vector<1x16xf32>
    %132 = vector.broadcast %131 : vector<1x16xf32> to vector<8x16xf32>
    %133 = arith.subf %129, %132 : vector<8x16xf32>
    %134 = math.exp %133 : vector<8x16xf32>
    %cst_39 = arith.constant dense<0.000000e+00> : vector<16xf32>
    %135 = vector.multi_reduction <add>, %134, %cst_39 [0] : vector<8x16xf32> to vector<16xf32>
    %136 = vector.shape_cast %135 : vector<16xf32> to vector<1x16xf32>
    %137 = tpu.reciprocal %136 {approx = true} : vector<1x16xf32> -> vector<1x16xf32>
    %138 = vector.broadcast %137 : vector<1x16xf32> to vector<8x16xf32>
    %139 = arith.mulf %134, %138 : vector<8x16xf32>
    %cst_40 = arith.constant 0.000000e+00 : f32
    %140 = vector.broadcast %cst_40 : f32 to vector<8x16xf32>
    %141 = arith.select %26, %139, %140 : vector<8x16xi1>, vector<8x16xf32>
    %cst_41 = arith.constant dense<0.000000e+00> : vector<16x16xf32>
    %142 = tpu.matmul %126, %141, %cst_41 {dimension_numbers = #tpu.dot_dimension_numbers<[1], [0], [0], [1], [0, 0, 1, 1], [], []>} : vector<16x8xf32>, vector<8x16xf32>, vector<16x16xf32> -> vector<16x16xf32>
    %143 = vector.shape_cast %142 : vector<16x16xf32> to vector<1x16x16xf32>
    %cst_42 = arith.constant dense<0xFF800000> : vector<1xf32>
    %144 = vector.multi_reduction <maximumf>, %143, %cst_42 [1, 2] : vector<1x16x16xf32> to vector<1xf32>
    %145 = vector.shape_cast %144 : vector<1xf32> to vector<1x1x1xf32>
    %146 = vector.extract %145[0, 0, 0] : f32 from vector<1x1x1xf32>
    %147 = vector.broadcast %146 : f32 to vector<16x16xf32>
    %148 = arith.subf %142, %147 : vector<16x16xf32>
    %149 = math.exp %148 : vector<16x16xf32>
    %cst_43 = arith.constant dense<0.000000e+00> : vector<16xf32>
    %150 = vector.multi_reduction <add>, %149, %cst_43 [0] : vector<16x16xf32> to vector<16xf32>
    %151 = vector.shape_cast %150 : vector<16xf32> to vector<1x16xf32>
    %152 = tpu.reciprocal %151 {approx = true} : vector<1x16xf32> -> vector<1x16xf32>
    %153 = vector.broadcast %152 : vector<1x16xf32> to vector<16x16xf32>
    %154 = arith.mulf %149, %153 : vector<16x16xf32>
    %cst_44 = arith.constant 0.000000e+00 : f32
    %155 = vector.broadcast %cst_44 : f32 to vector<16x16xf32>
    %156 = arith.select %29, %154, %155 : vector<16x16xi1>, vector<16x16xf32>
    %cst_45 = arith.constant dense<0.000000e+00> : vector<16xf32>
    %157 = vector.multi_reduction <add>, %149, %cst_45 [1] : vector<16x16xf32> to vector<16xf32>
    %158 = vector.shape_cast %157 : vector<16xf32> to vector<16x1xf32>
    %159 = tpu.reciprocal %158 {approx = true} : vector<16x1xf32> -> vector<16x1xf32>
    %160 = vector.broadcast %159 : vector<16x1xf32> to vector<16x16xf32>
    %161 = arith.mulf %149, %160 : vector<16x16xf32>
    %cst_46 = arith.constant 0.000000e+00 : f32
    %162 = vector.broadcast %cst_46 : f32 to vector<16x16xf32>
    %163 = arith.select %29, %161, %162 : vector<16x16xi1>, vector<16x16xf32>
    %c0_47 = arith.constant 0 : index
    %164 = arith.index_cast %c1_i32 : i32 to index
    %c0_48 = arith.constant 0 : index
    %c0_49 = arith.constant 0 : index
    %165 = vector.load %arg5[%c0_47, %164, %c0_48, %c0_49] : memref<1x4x16x16xf32, #tpu.memory_space<vmem>>, vector<1x1x16x16xf32>
    %166 = vector.shape_cast %165 : vector<1x1x16x16xf32> to vector<16x16xf32>
    %cst_50 = arith.constant dense<0.000000e+00> : vector<16x16xf32>
    %167 = tpu.matmul %166, %156, %cst_50 {dimension_numbers = #tpu.dot_dimension_numbers<[1], [0], [0], [1], [0, 0, 1, 1], [], []>} : vector<16x16xf32>, vector<16x16xf32>, vector<16x16xf32> -> vector<16x16xf32>
    %c0_51 = arith.constant 0 : index
    %168 = arith.index_cast %c1_i32 : i32 to index
    %c0_52 = arith.constant 0 : index
    %c0_53 = arith.constant 0 : index
    %169 = vector.load %arg6[%c0_51, %168, %c0_52, %c0_53] : memref<1x4x16x16xf32, #tpu.memory_space<vmem>>, vector<1x1x16x16xf32>
    %170 = vector.shape_cast %169 : vector<1x1x16x16xf32> to vector<16x16xf32>
    %cst_54 = arith.constant dense<0xFF800000> : vector<16xf32>
    %171 = vector.multi_reduction <maximumf>, %170, %cst_54 [0] : vector<16x16xf32> to vector<16xf32>
    %172 = vector.shape_cast %171 : vector<16xf32> to vector<1x16xf32>
    %173 = vector.broadcast %172 : vector<1x16xf32> to vector<16x16xf32>
    %174 = arith.subf %170, %173 : vector<16x16xf32>
    %175 = math.exp %174 : vector<16x16xf32>
    %cst_55 = arith.constant dense<0.000000e+00> : vector<16xf32>
    %176 = vector.multi_reduction <add>, %175, %cst_55 [0] : vector<16x16xf32> to vector<16xf32>
    %177 = vector.shape_cast %176 : vector<16xf32> to vector<1x16xf32>
    %178 = tpu.reciprocal %177 {approx = true} : vector<1x16xf32> -> vector<1x16xf32>
    %179 = vector.broadcast %178 : vector<1x16xf32> to vector<16x16xf32>
    %180 = arith.mulf %175, %179 : vector<16x16xf32>
    %cst_56 = arith.constant 0.000000e+00 : f32
    %181 = vector.broadcast %cst_56 : f32 to vector<16x16xf32>
    %182 = arith.select %32, %180, %181 : vector<16x16xi1>, vector<16x16xf32>
    %cst_57 = arith.constant dense<0.000000e+00> : vector<16x16xf32>
    %183 = tpu.matmul %163, %182, %cst_57 {dimension_numbers = #tpu.dot_dimension_numbers<[1], [0], [0], [1], [0, 0, 1, 1], [], []>} : vector<16x16xf32>, vector<16x16xf32>, vector<16x16xf32> -> vector<16x16xf32>
    %184 = arith.subf %167, %183 : vector<16x16xf32>
    %185 = arith.mulf %184, %184 : vector<16x16xf32>
    %186 = vector.shape_cast %185 : vector<16x16xf32> to vector<1x16x16xf32>
    %cst_58 = arith.constant dense<0.000000e+00> : vector<1xf32>
    %187 = vector.multi_reduction <add>, %186, %cst_58 [1, 2] : vector<1x16x16xf32> to vector<1xf32>
    %188 = vector.shape_cast %187 : vector<1xf32> to vector<1x1x1xf32>
    %189 = vector.extract %188[0, 0, 0] : f32 from vector<1x1x1xf32>
    %190 = arith.addf %111, %189 : f32
    %c2_i32 = arith.constant 2 : i32
    %c0_59 = arith.constant 0 : index
    %191 = arith.index_cast %c2_i32 : i32 to index
    %c0_60 = arith.constant 0 : index
    %c0_61 = arith.constant 0 : index
    %192 = vector.load %arg7[%c0_59, %191, %c0_60, %c0_61] : memref<1x4x16x8xf32, #tpu.memory_space<vmem>>, vector<1x1x16x8xf32>
    %193 = vector.shape_cast %192 : vector<1x1x16x8xf32> to vector<16x8xf32>
    %cst_62 = arith.constant dense<0xFF800000> : vector<16xf32>
    %194 = vector.multi_reduction <maximumf>, %193, %cst_62 [1] : vector<16x8xf32> to vector<16xf32>
    %195 = vector.shape_cast %194 : vector<16xf32> to vector<16x1xf32>
    %196 = vector.broadcast %195 : vector<16x1xf32> to vector<16x8xf32>
    %197 = arith.subf %193, %196 : vector<16x8xf32>
    %198 = math.exp %197 : vector<16x8xf32>
    %cst_63 = arith.constant dense<0.000000e+00> : vector<16xf32>
    %199 = vector.multi_reduction <add>, %198, %cst_63 [1] : vector<16x8xf32> to vector<16xf32>
    %200 = vector.shape_cast %199 : vector<16xf32> to vector<16x1xf32>
    %201 = tpu.reciprocal %200 {approx = true} : vector<16x1xf32> -> vector<16x1xf32>
    %202 = vector.broadcast %201 : vector<16x1xf32> to vector<16x8xf32>
    %203 = arith.mulf %198, %202 : vector<16x8xf32>
    %cst_64 = arith.constant 0.000000e+00 : f32
    %204 = vector.broadcast %cst_64 : f32 to vector<16x8xf32>
    %205 = arith.select %23, %203, %204 : vector<16x8xi1>, vector<16x8xf32>
    %c0_65 = arith.constant 0 : index
    %206 = arith.index_cast %c2_i32 : i32 to index
    %c0_66 = arith.constant 0 : index
    %c0_67 = arith.constant 0 : index
    %207 = vector.load %arg8[%c0_65, %206, %c0_66, %c0_67] : memref<1x4x8x16xf32, #tpu.memory_space<vmem>>, vector<1x1x8x16xf32>
    %208 = vector.shape_cast %207 : vector<1x1x8x16xf32> to vector<8x16xf32>
    %cst_68 = arith.constant dense<0xFF800000> : vector<16xf32>
    %209 = vector.multi_reduction <maximumf>, %208, %cst_68 [0] : vector<8x16xf32> to vector<16xf32>
    %210 = vector.shape_cast %209 : vector<16xf32> to vector<1x16xf32>
    %211 = vector.broadcast %210 : vector<1x16xf32> to vector<8x16xf32>
    %212 = arith.subf %208, %211 : vector<8x16xf32>
    %213 = math.exp %212 : vector<8x16xf32>
    %cst_69 = arith.constant dense<0.000000e+00> : vector<16xf32>
    %214 = vector.multi_reduction <add>, %213, %cst_69 [0] : vector<8x16xf32> to vector<16xf32>
    %215 = vector.shape_cast %214 : vector<16xf32> to vector<1x16xf32>
    %216 = tpu.reciprocal %215 {approx = true} : vector<1x16xf32> -> vector<1x16xf32>
    %217 = vector.broadcast %216 : vector<1x16xf32> to vector<8x16xf32>
    %218 = arith.mulf %213, %217 : vector<8x16xf32>
    %cst_70 = arith.constant 0.000000e+00 : f32
    %219 = vector.broadcast %cst_70 : f32 to vector<8x16xf32>
    %220 = arith.select %26, %218, %219 : vector<8x16xi1>, vector<8x16xf32>
    %cst_71 = arith.constant dense<0.000000e+00> : vector<16x16xf32>
    %221 = tpu.matmul %205, %220, %cst_71 {dimension_numbers = #tpu.dot_dimension_numbers<[1], [0], [0], [1], [0, 0, 1, 1], [], []>} : vector<16x8xf32>, vector<8x16xf32>, vector<16x16xf32> -> vector<16x16xf32>
    %222 = vector.shape_cast %221 : vector<16x16xf32> to vector<1x16x16xf32>
    %cst_72 = arith.constant dense<0xFF800000> : vector<1xf32>
    %223 = vector.multi_reduction <maximumf>, %222, %cst_72 [1, 2] : vector<1x16x16xf32> to vector<1xf32>
    %224 = vector.shape_cast %223 : vector<1xf32> to vector<1x1x1xf32>
    %225 = vector.extract %224[0, 0, 0] : f32 from vector<1x1x1xf32>
    %226 = vector.broadcast %225 : f32 to vector<16x16xf32>
    %227 = arith.subf %221, %226 : vector<16x16xf32>
    %228 = math.exp %227 : vector<16x16xf32>
    %cst_73 = arith.constant dense<0.000000e+00> : vector<16xf32>
    %229 = vector.multi_reduction <add>, %228, %cst_73 [0] : vector<16x16xf32> to vector<16xf32>
    %230 = vector.shape_cast %229 : vector<16xf32> to vector<1x16xf32>
    %231 = tpu.reciprocal %230 {approx = true} : vector<1x16xf32> -> vector<1x16xf32>
    %232 = vector.broadcast %231 : vector<1x16xf32> to vector<16x16xf32>
    %233 = arith.mulf %228, %232 : vector<16x16xf32>
    %cst_74 = arith.constant 0.000000e+00 : f32
    %234 = vector.broadcast %cst_74 : f32 to vector<16x16xf32>
    %235 = arith.select %29, %233, %234 : vector<16x16xi1>, vector<16x16xf32>
    %cst_75 = arith.constant dense<0.000000e+00> : vector<16xf32>
    %236 = vector.multi_reduction <add>, %228, %cst_75 [1] : vector<16x16xf32> to vector<16xf32>
    %237 = vector.shape_cast %236 : vector<16xf32> to vector<16x1xf32>
    %238 = tpu.reciprocal %237 {approx = true} : vector<16x1xf32> -> vector<16x1xf32>
    %239 = vector.broadcast %238 : vector<16x1xf32> to vector<16x16xf32>
    %240 = arith.mulf %228, %239 : vector<16x16xf32>
    %cst_76 = arith.constant 0.000000e+00 : f32
    %241 = vector.broadcast %cst_76 : f32 to vector<16x16xf32>
    %242 = arith.select %29, %240, %241 : vector<16x16xi1>, vector<16x16xf32>
    %c0_77 = arith.constant 0 : index
    %243 = arith.index_cast %c2_i32 : i32 to index
    %c0_78 = arith.constant 0 : index
    %c0_79 = arith.constant 0 : index
    %244 = vector.load %arg5[%c0_77, %243, %c0_78, %c0_79] : memref<1x4x16x16xf32, #tpu.memory_space<vmem>>, vector<1x1x16x16xf32>
    %245 = vector.shape_cast %244 : vector<1x1x16x16xf32> to vector<16x16xf32>
    %cst_80 = arith.constant dense<0.000000e+00> : vector<16x16xf32>
    %246 = tpu.matmul %245, %235, %cst_80 {dimension_numbers = #tpu.dot_dimension_numbers<[1], [0], [0], [1], [0, 0, 1, 1], [], []>} : vector<16x16xf32>, vector<16x16xf32>, vector<16x16xf32> -> vector<16x16xf32>
    %c0_81 = arith.constant 0 : index
    %247 = arith.index_cast %c2_i32 : i32 to index
    %c0_82 = arith.constant 0 : index
    %c0_83 = arith.constant 0 : index
    %248 = vector.load %arg6[%c0_81, %247, %c0_82, %c0_83] : memref<1x4x16x16xf32, #tpu.memory_space<vmem>>, vector<1x1x16x16xf32>
    %249 = vector.shape_cast %248 : vector<1x1x16x16xf32> to vector<16x16xf32>
    %cst_84 = arith.constant dense<0xFF800000> : vector<16xf32>
    %250 = vector.multi_reduction <maximumf>, %249, %cst_84 [0] : vector<16x16xf32> to vector<16xf32>
    %251 = vector.shape_cast %250 : vector<16xf32> to vector<1x16xf32>
    %252 = vector.broadcast %251 : vector<1x16xf32> to vector<16x16xf32>
    %253 = arith.subf %249, %252 : vector<16x16xf32>
    %254 = math.exp %253 : vector<16x16xf32>
    %cst_85 = arith.constant dense<0.000000e+00> : vector<16xf32>
    %255 = vector.multi_reduction <add>, %254, %cst_85 [0] : vector<16x16xf32> to vector<16xf32>
    %256 = vector.shape_cast %255 : vector<16xf32> to vector<1x16xf32>
    %257 = tpu.reciprocal %256 {approx = true} : vector<1x16xf32> -> vector<1x16xf32>
    %258 = vector.broadcast %257 : vector<1x16xf32> to vector<16x16xf32>
    %259 = arith.mulf %254, %258 : vector<16x16xf32>
    %cst_86 = arith.constant 0.000000e+00 : f32
    %260 = vector.broadcast %cst_86 : f32 to vector<16x16xf32>
    %261 = arith.select %32, %259, %260 : vector<16x16xi1>, vector<16x16xf32>
    %cst_87 = arith.constant dense<0.000000e+00> : vector<16x16xf32>
    %262 = tpu.matmul %242, %261, %cst_87 {dimension_numbers = #tpu.dot_dimension_numbers<[1], [0], [0], [1], [0, 0, 1, 1], [], []>} : vector<16x16xf32>, vector<16x16xf32>, vector<16x16xf32> -> vector<16x16xf32>
    %263 = arith.subf %246, %262 : vector<16x16xf32>
    %264 = arith.mulf %263, %263 : vector<16x16xf32>
    %265 = vector.shape_cast %264 : vector<16x16xf32> to vector<1x16x16xf32>
    %cst_88 = arith.constant dense<0.000000e+00> : vector<1xf32>
    %266 = vector.multi_reduction <add>, %265, %cst_88 [1, 2] : vector<1x16x16xf32> to vector<1xf32>
    %267 = vector.shape_cast %266 : vector<1xf32> to vector<1x1x1xf32>
    %268 = vector.extract %267[0, 0, 0] : f32 from vector<1x1x1xf32>
    %269 = arith.addf %190, %268 : f32
    %c3_i32 = arith.constant 3 : i32
    %c0_89 = arith.constant 0 : index
    %270 = arith.index_cast %c3_i32 : i32 to index
    %c0_90 = arith.constant 0 : index
    %c0_91 = arith.constant 0 : index
    %271 = vector.load %arg7[%c0_89, %270, %c0_90, %c0_91] : memref<1x4x16x8xf32, #tpu.memory_space<vmem>>, vector<1x1x16x8xf32>
    %272 = vector.shape_cast %271 : vector<1x1x16x8xf32> to vector<16x8xf32>
    %cst_92 = arith.constant dense<0xFF800000> : vector<16xf32>
    %273 = vector.multi_reduction <maximumf>, %272, %cst_92 [1] : vector<16x8xf32> to vector<16xf32>
    %274 = vector.shape_cast %273 : vector<16xf32> to vector<16x1xf32>
    %275 = vector.broadcast %274 : vector<16x1xf32> to vector<16x8xf32>
    %276 = arith.subf %272, %275 : vector<16x8xf32>
    %277 = math.exp %276 : vector<16x8xf32>
    %cst_93 = arith.constant dense<0.000000e+00> : vector<16xf32>
    %278 = vector.multi_reduction <add>, %277, %cst_93 [1] : vector<16x8xf32> to vector<16xf32>
    %279 = vector.shape_cast %278 : vector<16xf32> to vector<16x1xf32>
    %280 = tpu.reciprocal %279 {approx = true} : vector<16x1xf32> -> vector<16x1xf32>
    %281 = vector.broadcast %280 : vector<16x1xf32> to vector<16x8xf32>
    %282 = arith.mulf %277, %281 : vector<16x8xf32>
    %cst_94 = arith.constant 0.000000e+00 : f32
    %283 = vector.broadcast %cst_94 : f32 to vector<16x8xf32>
    %284 = arith.select %23, %282, %283 : vector<16x8xi1>, vector<16x8xf32>
    %c0_95 = arith.constant 0 : index
    %285 = arith.index_cast %c3_i32 : i32 to index
    %c0_96 = arith.constant 0 : index
    %c0_97 = arith.constant 0 : index
    %286 = vector.load %arg8[%c0_95, %285, %c0_96, %c0_97] : memref<1x4x8x16xf32, #tpu.memory_space<vmem>>, vector<1x1x8x16xf32>
    %287 = vector.shape_cast %286 : vector<1x1x8x16xf32> to vector<8x16xf32>
    %cst_98 = arith.constant dense<0xFF800000> : vector<16xf32>
    %288 = vector.multi_reduction <maximumf>, %287, %cst_98 [0] : vector<8x16xf32> to vector<16xf32>
    %289 = vector.shape_cast %288 : vector<16xf32> to vector<1x16xf32>
    %290 = vector.broadcast %289 : vector<1x16xf32> to vector<8x16xf32>
    %291 = arith.subf %287, %290 : vector<8x16xf32>
    %292 = math.exp %291 : vector<8x16xf32>
    %cst_99 = arith.constant dense<0.000000e+00> : vector<16xf32>
    %293 = vector.multi_reduction <add>, %292, %cst_99 [0] : vector<8x16xf32> to vector<16xf32>
    %294 = vector.shape_cast %293 : vector<16xf32> to vector<1x16xf32>
    %295 = tpu.reciprocal %294 {approx = true} : vector<1x16xf32> -> vector<1x16xf32>
    %296 = vector.broadcast %295 : vector<1x16xf32> to vector<8x16xf32>
    %297 = arith.mulf %292, %296 : vector<8x16xf32>
    %cst_100 = arith.constant 0.000000e+00 : f32
    %298 = vector.broadcast %cst_100 : f32 to vector<8x16xf32>
    %299 = arith.select %26, %297, %298 : vector<8x16xi1>, vector<8x16xf32>
    %cst_101 = arith.constant dense<0.000000e+00> : vector<16x16xf32>
    %300 = tpu.matmul %284, %299, %cst_101 {dimension_numbers = #tpu.dot_dimension_numbers<[1], [0], [0], [1], [0, 0, 1, 1], [], []>} : vector<16x8xf32>, vector<8x16xf32>, vector<16x16xf32> -> vector<16x16xf32>
    %301 = vector.shape_cast %300 : vector<16x16xf32> to vector<1x16x16xf32>
    %cst_102 = arith.constant dense<0xFF800000> : vector<1xf32>
    %302 = vector.multi_reduction <maximumf>, %301, %cst_102 [1, 2] : vector<1x16x16xf32> to vector<1xf32>
    %303 = vector.shape_cast %302 : vector<1xf32> to vector<1x1x1xf32>
    %304 = vector.extract %303[0, 0, 0] : f32 from vector<1x1x1xf32>
    %305 = vector.broadcast %304 : f32 to vector<16x16xf32>
    %306 = arith.subf %300, %305 : vector<16x16xf32>
    %307 = math.exp %306 : vector<16x16xf32>
    %cst_103 = arith.constant dense<0.000000e+00> : vector<16xf32>
    %308 = vector.multi_reduction <add>, %307, %cst_103 [0] : vector<16x16xf32> to vector<16xf32>
    %309 = vector.shape_cast %308 : vector<16xf32> to vector<1x16xf32>
    %310 = tpu.reciprocal %309 {approx = true} : vector<1x16xf32> -> vector<1x16xf32>
    %311 = vector.broadcast %310 : vector<1x16xf32> to vector<16x16xf32>
    %312 = arith.mulf %307, %311 : vector<16x16xf32>
    %cst_104 = arith.constant 0.000000e+00 : f32
    %313 = vector.broadcast %cst_104 : f32 to vector<16x16xf32>
    %314 = arith.select %29, %312, %313 : vector<16x16xi1>, vector<16x16xf32>
    %cst_105 = arith.constant dense<0.000000e+00> : vector<16xf32>
    %315 = vector.multi_reduction <add>, %307, %cst_105 [1] : vector<16x16xf32> to vector<16xf32>
    %316 = vector.shape_cast %315 : vector<16xf32> to vector<16x1xf32>
    %317 = tpu.reciprocal %316 {approx = true} : vector<16x1xf32> -> vector<16x1xf32>
    %318 = vector.broadcast %317 : vector<16x1xf32> to vector<16x16xf32>
    %319 = arith.mulf %307, %318 : vector<16x16xf32>
    %cst_106 = arith.constant 0.000000e+00 : f32
    %320 = vector.broadcast %cst_106 : f32 to vector<16x16xf32>
    %321 = arith.select %29, %319, %320 : vector<16x16xi1>, vector<16x16xf32>
    %c0_107 = arith.constant 0 : index
    %322 = arith.index_cast %c3_i32 : i32 to index
    %c0_108 = arith.constant 0 : index
    %c0_109 = arith.constant 0 : index
    %323 = vector.load %arg5[%c0_107, %322, %c0_108, %c0_109] : memref<1x4x16x16xf32, #tpu.memory_space<vmem>>, vector<1x1x16x16xf32>
    %324 = vector.shape_cast %323 : vector<1x1x16x16xf32> to vector<16x16xf32>
    %cst_110 = arith.constant dense<0.000000e+00> : vector<16x16xf32>
    %325 = tpu.matmul %324, %314, %cst_110 {dimension_numbers = #tpu.dot_dimension_numbers<[1], [0], [0], [1], [0, 0, 1, 1], [], []>} : vector<16x16xf32>, vector<16x16xf32>, vector<16x16xf32> -> vector<16x16xf32>
    %c0_111 = arith.constant 0 : index
    %326 = arith.index_cast %c3_i32 : i32 to index
    %c0_112 = arith.constant 0 : index
    %c0_113 = arith.constant 0 : index
    %327 = vector.load %arg6[%c0_111, %326, %c0_112, %c0_113] : memref<1x4x16x16xf32, #tpu.memory_space<vmem>>, vector<1x1x16x16xf32>
    %328 = vector.shape_cast %327 : vector<1x1x16x16xf32> to vector<16x16xf32>
    %cst_114 = arith.constant dense<0xFF800000> : vector<16xf32>
    %329 = vector.multi_reduction <maximumf>, %328, %cst_114 [0] : vector<16x16xf32> to vector<16xf32>
    %330 = vector.shape_cast %329 : vector<16xf32> to vector<1x16xf32>
    %331 = vector.broadcast %330 : vector<1x16xf32> to vector<16x16xf32>
    %332 = arith.subf %328, %331 : vector<16x16xf32>
    %333 = math.exp %332 : vector<16x16xf32>
    %cst_115 = arith.constant dense<0.000000e+00> : vector<16xf32>
    %334 = vector.multi_reduction <add>, %333, %cst_115 [0] : vector<16x16xf32> to vector<16xf32>
    %335 = vector.shape_cast %334 : vector<16xf32> to vector<1x16xf32>
    %336 = tpu.reciprocal %335 {approx = true} : vector<1x16xf32> -> vector<1x16xf32>
    %337 = vector.broadcast %336 : vector<1x16xf32> to vector<16x16xf32>
    %338 = arith.mulf %333, %337 : vector<16x16xf32>
    %cst_116 = arith.constant 0.000000e+00 : f32
    %339 = vector.broadcast %cst_116 : f32 to vector<16x16xf32>
    %340 = arith.select %32, %338, %339 : vector<16x16xi1>, vector<16x16xf32>
    %cst_117 = arith.constant dense<0.000000e+00> : vector<16x16xf32>
    %341 = tpu.matmul %321, %340, %cst_117 {dimension_numbers = #tpu.dot_dimension_numbers<[1], [0], [0], [1], [0, 0, 1, 1], [], []>} : vector<16x16xf32>, vector<16x16xf32>, vector<16x16xf32> -> vector<16x16xf32>
    %342 = arith.subf %325, %341 : vector<16x16xf32>
    %343 = arith.mulf %342, %342 : vector<16x16xf32>
    %344 = vector.shape_cast %343 : vector<16x16xf32> to vector<1x16x16xf32>
    %cst_118 = arith.constant dense<0.000000e+00> : vector<1xf32>
    %345 = vector.multi_reduction <add>, %344, %cst_118 [1, 2] : vector<1x16x16xf32> to vector<1xf32>
    %346 = vector.shape_cast %345 : vector<1xf32> to vector<1x1x1xf32>
    %347 = vector.extract %346[0, 0, 0] : f32 from vector<1x1x1xf32>
    %348 = arith.addf %269, %347 : f32
    %c4_i32 = arith.constant 4 : i32
    %349 = vector.broadcast %348 : f32 to vector<1x1xf32>
    %c0_119 = arith.constant 0 : index
    %c0_120 = arith.constant 0 : index
    %c0_121 = arith.constant 0 : index
    %c0_122 = arith.constant 0 : index
    %350 = vector.load %arg9[%c0_119, %c0_120, %c0_121, %c0_122] : memref<1x1x1x1xf32, #tpu.memory_space<vmem>>, vector<1x1x1x1xf32>
    %351 = vector.shape_cast %350 : vector<1x1x1x1xf32> to vector<1x1xf32>
    %352 = vector.shape_cast %349 : vector<1x1xf32> to vector<1x1x1x1xf32>
    tpu.vector_store %arg9[%c0_119, %c0_120, %c0_121, %c0_122], %352 {strides = array<i32>} : memref<1x1x1x1xf32, #tpu.memory_space<vmem>>, vector<1x1x1x1xf32>,
    return
  }
  func.func @transform_0(%arg0: i32, %arg1: i32, %arg2: memref<2xi32, #tpu.memory_space<smem>>, %arg3: memref<2xi32, #tpu.memory_space<smem>>, %arg4: memref<2xi32, #tpu.memory_space<smem>>) -> (i32, i32, i32, i32) {
    %c0_i32 = arith.constant 0 : i32
    %c0_i32_0 = arith.constant 0 : i32
    %c0_i32_1 = arith.constant 0 : i32
    return %arg0, %arg1, %c0_i32, %c0_i32_0 : i32, i32, i32, i32
  }
  func.func @transform_1(%arg0: i32, %arg1: i32, %arg2: memref<2xi32, #tpu.memory_space<smem>>, %arg3: memref<2xi32, #tpu.memory_space<smem>>, %arg4: memref<2xi32, #tpu.memory_space<smem>>) -> (i32, i32, i32, i32) {
    %c0_i32 = arith.constant 0 : i32
    %c0_i32_0 = arith.constant 0 : i32
    %c0_i32_1 = arith.constant 0 : i32
    return %arg0, %arg1, %c0_i32, %c0_i32_0 : i32, i32, i32, i32
  }
  func.func @transform_2(%arg0: i32, %arg1: i32, %arg2: memref<2xi32, #tpu.memory_space<smem>>, %arg3: memref<2xi32, #tpu.memory_space<smem>>, %arg4: memref<2xi32, #tpu.memory_space<smem>>) -> (i32, i32, i32, i32) {
    %c0_i32 = arith.constant 0 : i32
    %c0_i32_0 = arith.constant 0 : i32
    %c0_i32_1 = arith.constant 0 : i32
    return %arg0, %arg1, %c0_i32, %c0_i32_0 : i32, i32, i32, i32
  }
  func.func @transform_3(%arg0: i32, %arg1: i32, %arg2: memref<2xi32, #tpu.memory_space<smem>>, %arg3: memref<2xi32, #tpu.memory_space<smem>>, %arg4: memref<2xi32, #tpu.memory_space<smem>>) -> (i32, i32, i32, i32) {
    %c0_i32 = arith.constant 0 : i32
    %c0_i32_0 = arith.constant 0 : i32
    %c0_i32_1 = arith.constant 0 : i32
    return %arg0, %arg1, %c0_i32, %c0_i32_0 : i32, i32, i32, i32
  }
  func.func @transform_4(%arg0: i32, %arg1: i32, %arg2: memref<2xi32, #tpu.memory_space<smem>>, %arg3: memref<2xi32, #tpu.memory_space<smem>>, %arg4: memref<2xi32, #tpu.memory_space<smem>>) -> (i32, i32, i32, i32) {
    %c0_i32 = arith.constant 0 : i32
    %c0_i32_0 = arith.constant 0 : i32
    %c0_i32_1 = arith.constant 0 : i32
    return %arg0, %arg1, %c0_i32, %c0_i32_0 : i32, i32, i32, i32
  }
}

</mosaic_0001>

<bundles_post_ra>
// kernel: tpu_custom_call.1
= control target key start
LH: loop header
LB: loop body
LE: loop exit
PB: predicated region body
PF: predicated region fallthrough
CT: control target
= control target key end

     0   :  { %s3160_s0 = inlined_call_operand.vmem [shape: s32[2], index: 0, kind: input, shape index: {}]   ;;  %s3161_s3 = inlined_call_operand.vmem [shape: f32[2,4,16,16], index: 3, kind: input, shape index: {}]   ;;  %s3162_s4 = inlined_call_operand.hbm [shape: f32[2,4,16,16], index: 4, kind: input, shape index: {}]   ;;  %s3163_s5 = inlined_call_operand.vmem [shape: f32[2,4,16,8], index: 5, kind: input, shape index: {}]   ;;  %s3164_s6 = inlined_call_operand.vmem [shape: f32[2,4,8,16], index: 6, kind: input, shape index: {}]   ;;  %s3165_s7 = inlined_call_operand.vmem [shape: f32[2,1,1,1], index: 7, kind: output, shape index: {}]   ;;  %s3166_s1 = inlined_call_operand.vmem [shape: s32[2], index: 1, kind: input, shape index: {}]   ;;  %s3167_s2 = inlined_call_operand.vmem [shape: s32[2], index: 2, kind: input, shape index: {}]  }
   0x1   :  { %s12_s26 = sshll.u32 %s3160_s0, 4  ;;  %s16_s29 = sshll.u32 %s3166_s1, 4  ;;  %s13_s26 = int_to_ptr.vmem [resolvable:$true] %s12_s26  ;;  %s17_s29 = int_to_ptr.vmem [resolvable:$true] %s16_s29 }
   0x2   :  { %s2541_s30 = scalar_lea.vmem %s13_s26, 16  ;;  %p2546_p1 = scmp.lt.s32.totalorder %s13_s26, %s13_s26 }
   0x3   :  { %p2542_p0 = scmp.ne.s32.totalorder %s13_s26, %s2541_s30  ;;  %p2547_p2 = scmp.lt.s32.totalorder %s2541_s30, %s2541_s30 }
   0x5   :  { %p2548_p3 = por %p2547_p2, %p2546_p1 }
   0x7   :  { %p2549_p4 = pnand %p2548_p3, %p2542_p0 }
   0x9   :  { %2552 = shalt.err (!%p2549_p4)  }
   0xa   :  { %s2661_s8 = smov [#allocation3]   ;;  %s2553_s9 = scalar_lea.vmem %s17_s29, 16 }
   0xb   :  { %15 = dma.vmem_to_smem %s13_s26, 16, %s2661_s8, [#allocation2] }
   0xc   :  { %p2554_p5 = scmp.ne.s32.totalorder %s17_s29, %s2553_s9  ;;  %p2558_p6 = scmp.lt.s32.totalorder %s17_s29, %s17_s29 }
   0xd   :  { %p2559_p7 = scmp.lt.s32.totalorder %s2553_s9, %s2553_s9 }
   0xf   :  { %p2560_p8 = por %p2559_p7, %p2558_p6 }
  0x11   :  { %p2561_p9 = pnand %p2560_p8, %p2554_p5 }
  0x13   :  { %2564 = shalt.err (!%p2561_p9)  }
  0x14   :  { %s2662_s0 = smov [#allocation4]   ;;  %s20_s11 = sshll.u32 %s3167_s2, 4  ;;  %s21_s11 = int_to_ptr.vmem [resolvable:$true] %s20_s11 }
  0x15   :  { %19 = dma.vmem_to_smem %s17_s29, 16, %s2662_s0, [#allocation2] }
  0x16   :  { %s2565_s12 = scalar_lea.vmem %s21_s11, 16  ;;  %p2570_p11 = scmp.lt.s32.totalorder %s21_s11, %s21_s11 }
  0x17   :  { %p2566_p10 = scmp.ne.s32.totalorder %s21_s11, %s2565_s12  ;;  %p2571_p12 = scmp.lt.s32.totalorder %s2565_s12, %s2565_s12 }
  0x19   :  { %p2572_p13 = por %p2571_p12, %p2570_p11 }
  0x1b   :  { %p2573_p0 = pnand %p2572_p13, %p2566_p10 }
  0x1d   :  { %2576 = shalt.err (!%p2573_p0)  }
  0x1e   :  { %s2663_s13 = smov [#allocation5]  }
  0x1f   :  { %23 = dma.vmem_to_smem %s21_s11, 16, %s2663_s13, [#allocation2] }
  0x20   :  { %2631 = dma.done.wait [#allocation2], 48 }
  0x21   :  { %2632 = vsyncadd [#allocation2], 4294967248 }
  0x22   :  { %25 = sfence }
  0x23   :  { %26 = vsyncpa [#allocation7], 0 }
  0x24   :  { %28 = vsyncpa [#allocation7 + $0x1], 0  ;;  %s2716_s14 = smov 0   ;;  %s2718_s15 = smov 0  }
  0x25   :  { %s2720_s2 = smov 0   ;;  %s2722_s16 = smov 0  }
  0x26   :  { %s2724_s17 = smov 0   ;;  %s2726_s18 = smov 0  }
  0x27 LB: > { %s2099_s19 = sadd.s32 4294967295, %s2659_s18   ;;  %s46_s20 = sadd.s32 1, %s2655_s17  ;;  %s2659_s18 = sphi %s2726_s18, %s34_s18   ;;  %s2655_s17 = sphi %s2724_s17, %s3189_s17   ;;  %s2651_s16 = sphi %s2722_s16, %s3188_s16   ;;  %s2647_s2 = sphi %s2720_s2, %s3187_s2   ;;  %s2643_s15 = sphi %s2718_s15, %s3186_s15   ;;  %s2639_s14 = sphi %s2716_s14, %s3185_s14  }
  0x28   : > { %p48_p1 = scmp.ge.s32.totalorder %s46_s20, 2  ;;  %s83_s21 = sadd.s32 1, %s2647_s2 }
  0x29   : > { %p90_p2 = scmp.ne.s32.totalorder %s2647_s2, %s2643_s15  ;;  %p91_p3 = scmp.eq.s32.totalorder %s2659_s18, 0 }
  0x2a   : > { %s3191_s20 = smov (%p48_p1, %s46_s20), 0  ;;  %p96_p5 = scmp.ne.s32.totalorder %s2643_s15, %s2639_s14 }
  0x2b   : > { %p2752_p4 = por %p91_p3, %p90_p2  ;;  %s78_s23 = ssub.s32 %s2655_s17, %s3191_s20 }
  0x2c   : > { %p97_p6 = scmp.eq.s32.totalorder %s2099_s19, 0  ;;  %p81_p7 = scmp.eq.s32.totalorder %s78_s23, 0 }
  0x2d   : > { %p2375_p9 = scmp.lt.s32.totalorder %s2659_s18, 2  ;;  %s218_s26 = sand.u32 1, %s2647_s2  }
  0x2e   : > { %p2759_p8 = por %p97_p6, %p96_p5  ;;  %s2181_s27 = sshll.u32 %s2655_s17, 10 }
  0x2f   : > { %s2765_s25 = scalar_select %p81_p7, %s2647_s2, %s83_s21  }
  0x30   : > { %s2103_s28 = sshll.u32 %s218_s26, 6  ;;  %s2772_s8 = scalar_lea.hbm %s3162_s4, %s2181_s27 }
  0x31   : > { %s222_s9 = scalar_lea.vmem [#allocation6], %s2103_s28  ;;  %p2776_p10 = pnand %p2375_p9, %p2752_p4 }
  0x32   : > { %s232_s0 = sshll.u32 %s222_s9, 4  ;;  %s2782_s10 = scalar_lea.sflag [#allocation7], %s218_s26  ;;  %s2780_s0 = int_to_ptr.vmem [resolvable:$true] %s232_s0 }
  0x33   : > { %s2577_s11 = scalar_lea.hbm %s2772_s8, 1024  ;;  %p2579_p12 = pneg %p2776_p10 }
  0x34   : > { %p2578_p11 = scmp.ne.s32.totalorder %s2772_s8, %s2577_s11  ;;  %s2582_s14 = scalar_lea.hbm %s3162_s4, 2048 }
  0x35   : > { %p2583_p1 = scmp.lt.u32.totalorder %s2772_s8, %s3162_s4  ;;  %p2584_p2 = scmp.lt.u32.totalorder %s2582_s14, %s2577_s11 }
  0x36   : > { %p2580_p13 = pnand %p2579_p12, %p2578_p11  ;;  %p2586_p4 = scmp.lt.u32.totalorder %s2577_s11, %s2772_s8 }
  0x37   : > { %p2585_p3 = por %p2584_p2, %p2583_p1 }
  0x38   : > { %p2581_p0 = pneg %p2580_p13 }
  0x39   : > { %p2587_p5 = por %p2586_p4, %p2585_p3 }
  0x3b   : > { %p2588_p6 = pnand %p2587_p5, %p2581_p0 }
  0x3d   : > { %2591 = shalt.err (!%p2588_p6)
}
  0x3e   : > { %s2592_s22 = scalar_lea.vmem %s2780_s0, 1024  ;;  %s2664_s23 = smov [#allocation6]  }
  0x3f   : > { %p2593_p7 = scmp.ne.s32.totalorder %s2780_s0, %s2592_s22  ;;  %s2597_s26 = sshll.u32 %s2664_s23, 4  ;;  %s2598_s26 = int_to_ptr.vmem [resolvable:$false] %s2597_s26 }
  0x40   : > { %s2599_s27 = scalar_lea.vmem %s2598_s26, 2048  ;;  %p2600_p13 = scmp.lt.s32.totalorder %s2780_s0, %s2598_s26 }
  0x41   : > { %p2595_p9 = pnand %p2593_p7, %p2579_p12  ;;  %p2601_p1 = scmp.lt.s32.totalorder %s2599_s27, %s2592_s22 }
  0x43   : > { %p2596_p11 = pneg %p2595_p9  ;;  %p2602_p2 = por %p2601_p1, %p2600_p13 }
  0x45   : > { %p2603_p3 = pnand %p2602_p2, %p2596_p11 }
  0x47   : > { %2606 = shalt.err (!%p2603_p3)
}
  0x48   : > { %s2665_s28 = smov 128   ;;  %s2666_s29 = smov 8  }
  0x49   : > { %2374 = dma.hbm_to_vmem [thread:$0]  (!%p2776_p10), %s2772_s8, 1024, %s2780_s0, %s2782_s10, %s2665_s28, %s2665_s28, %s2666_s29  }
  0x4a   : > { %p2106_p12 = scmp.ge.s32.totalorder %s2659_s18, 1  ;;  %p267_p0 = scmp.lt.s32.totalorder %s2659_s18, 3 }
  0x4c   : > { %p268_p4 = pnand %p2106_p12, %p267_p0 }
  0x4d   : > { %s273_s30 = sand.u32 (!%p268_p4), 1, %s2643_s15  }
  0x4e   : > { %271 = sbr.rel (%p268_p4) target bundleno = 3231 (0xc9f), region = 36  ;;  %s2107_s9 = sshll.u32 (!%p268_p4), %s273_s30, 6 }
  0x4f   : > { %s274_s11 = scalar_lea.sflag (!%p268_p4), [#allocation7], %s273_s30  ;;  %s2813_s12 = scalar_lea.vmem (!%p268_p4), [#allocation6], %s2107_s9 }
  0x55   : > { %2634 = dma.done.wait (%p2759_p8), %s274_s11, 1024  }
  0x56   : > { %2636 = vsyncadd (%p2759_p8), %s274_s11, 4294966272  ;;  %p333_p5 = scmp.lt.s32.totalorder %s2651_s16, 1  ;;  %vm412_vm0 = vcmask 64512   ;;  %vm438_vm1 = vcmask 130048   ;;  %s371_s22 = sld [smem:[#allocation3 + %s2651_s16]]  ;;  %v374_v32 = vlaneseq }
  0x57   : > { %s372_s23 = sld [smem:[#allocation4 + %s2651_s16]] }
  0x58   : > { %s2821_s8 = scalar_select %p333_p5, %s2651_s16, 1  ;;  %v375_v33 = vshrl.u32 %v374_v32, 7  ;;  %v386_v35 = vand.u32 127, %v374_v32 }
  0x59   : > { %s373_s26 = sld [smem:[#allocation5 + %s2651_s16]] }
  0x5a   : > { %s2182_s0 = sshll.u32 %s2821_s8, 6  ;;  %s2184_s24 = sshll.u32 %s2821_s8, 5  ;;  %v376_v34 = vadd.s32 8, %v375_v33 }
  0x5b   : > { %s2829_s13 = scalar_lea.vmem %s3163_s5, %s2182_s0  ;;  %s2839_s21 = scalar_lea.vmem %s3164_s6, %s2184_s24 }
  0x5c   : > { %v410_v0 = vld [vmem:[%s2829_s13] sm:$0xff]  ;;  %v411_v1 = vld [vmem:[%s2829_s13 + $0x8] sm:$0xff]  ;;  %v377_v36 = vstv %s371_s22  ;;  %v2125_v55 = vld [vmem:[%s2829_s13 + $0x10] sm:$0xff]  ;;  %s2919_s29 = scalar_lea.vmem %s3161_s3, %s2182_s0 }
  0x5d   : > { %v413_v2 = vsel %vm412_vm0, %v410_v0, -inf  ;;  %v416_v3 = vsel %vm412_vm0, %v411_v1, -inf  ;;  %v437_v4 = vld [vmem:[%s2839_s21] sm:$0xff]  ;;  %v382_v37 = vstv %s372_s23  ;;  %vm378_vm2 = vcmp.lt.s32.totalorder %v375_v33, %v377_v36  ;;  %v2126_v62 = vld [vmem:[%s2829_s13 + $0x18] sm:$0xff] }
  0x5e   : > { %414 = vmax.xlane.f32.xlu0 %v413_v2  ;;  %v439_v5 = vsel %vm438_vm1, %v437_v4, -inf  ;;  %vm379_vm3 = vcmp.lt.s32.totalorder %v376_v34, %v377_v36  ;;  %vm383_vm4 = vcmp.lt.s32.totalorder %v375_v33, %v382_v37  ;;  %vm384_vm6 = vcmp.lt.s32.totalorder %v376_v34, %v382_v37 }
  0x5f   : > { %v440_v6 = vrot.slane %v439_v5, 4  ;;  %v380_v38 = vstv %s373_s26  ;;  %vm388_vm8 = vcmp.lt.s32.totalorder %v386_v35, %v382_v37  ;;  %v798_v56 = vsel %vm412_vm0, %v2125_v55, -inf }
  0x60   : > { %vm381_vm5 = vcmp.lt.s32.totalorder %v375_v33, %v380_v38  ;;  %vm387_vm7 = vcmp.lt.s32.totalorder %v386_v35, %v380_v38  ;;  %vm2861_vm12 = vmand %vm378_vm2, %vm388_vm8  ;;  %v801_v63 = vsel %vm412_vm0, %v2126_v62, -inf }
  0x61   : > { %v441_v7 = vmax.f32 %v439_v5, %v440_v6  ;;  %vm2849_vm9 = vmand %vm378_vm2, %vm387_vm7 }
  0x62   : > { %417 = vmax.xlane.f32.xlu0 %v416_v3  ;;  %vm2853_vm10 = vmand %vm379_vm3, %vm387_vm7 }
  0x63   : > { %v442_v8 = vrot.slane %v441_v7, 2  ;;  %vm2857_vm11 = vmand %vm381_vm5, %vm388_vm8 }
  0x64   : > { %vm2867_vm13 = vmand %vm379_vm3, %vm388_vm8 }
  0x65   : > { %v443_v10 = vmax.f32 %v441_v7, %v442_v8  ;;  %vm408_vm14 = vmand %vm383_vm4, %vm388_vm8  ;;  %v666_v7 = vld [vmem:[%s2813_s12] sm:$0xff]  ;;  %v667_v8 = vld [vmem:[%s2813_s12 + $0x8] sm:$0xff] }
  0x66   : > { %vm409_vm15 = vmand %vm384_vm6, %vm388_vm8 }
  0x67   : > { %v444_v12 = vrot.slane %v443_v10, 1  ;;  %vm2873_vm5 = vmpackc.low %vm409_vm15, %vm408_vm14 }
  0x68   : > { %vm2929_vm2 = vmpackc.low %vm2867_vm13, %vm2861_vm12 }
  0x69   : > { %v445_v15 = vmax.f32 %v443_v10, %v444_v12  ;;  %v669_v10 = vsel %vm438_vm1, %v667_v8, -inf }
  0x6b   : > { %v446_v17 = vsub.f32 %v437_v4, %v445_v15 }
  0x6d   : > { %v447_v19 = vmul.f32 1.442695, %v446_v17 }
  0xeb   : > { %v415_v9 = vpop.xlane.xlu0 %414 }
  0xec   : > { %v419_v11 = vsub.f32 %v410_v0, %v415_v9  ;;  %v668_v9 = vsel %vm438_vm1, %v666_v7, -inf }
  0xee   : > { %v421_v13 = vmul.f32 1.442695, %v419_v11  ;;  %v670_v11 = vmax.f32 %v668_v9, %v669_v10 }
  0xef   : > { %v418_v14 = vpop.xlane.xlu0 %417 }
  0xf0   : > { %2429 = vpow2.f32 %v421_v13  ;;  %v420_v16 = vsub.f32 %v411_v1, %v418_v14  ;;  %v671_v12 = vrot.slane %v670_v11, 4 }
  0xf2   : > { %v423_v18 = vmul.f32 1.442695, %v420_v16  ;;  %v672_v13 = vmax.f32 %v670_v11, %v671_v12 }
  0xf4   : > { %2431 = vpow2.f32 %v423_v18  ;;  %v673_v15 = vrot.slane %v672_v13, 2 }
  0xf5   : > { %2433 = vpow2.f32 %v447_v19 }
  0xf6   : > { %v674_v17 = vmax.f32 %v672_v13, %v673_v15 }
  0xf8   : > { %v675_v19 = vrot.slane %v674_v17, 1 }
  0xfa   : > { %v2430_v20 = vpop.eup %2429 }
  0xfb   : > { %v425_v21 = vsel %vm412_vm0, %v2430_v20, 0.0 }
  0xfc   : > { %426 = vadd.xlane.f32.xlu1 %v425_v21 }
  0xfe   : > { %v2432_v22 = vpop.eup %2431 }
  0xff   : > { %v2434_v23 = vpop.eup %2433  ;;  %v428_v24 = vsel %vm412_vm0, %v2432_v22, 0.0 }
 0x100   : > { %429 = vadd.xlane.f32.xlu1 %v428_v24  ;;  %v449_v25 = vsel %vm438_vm1, %v2434_v23, 0.0 }
 0x101   : > { %v450_v26 = vrot.slane %v449_v25, 4 }
 0x103   : > { %v451_v27 = vadd.f32 %v450_v26, %v449_v25 }
 0x104   : > { %799 = vmax.xlane.f32.xlu1 %v798_v56 }
 0x105   : > { %v452_v28 = vrot.slane %v451_v27, 2 }
 0x107   : > { %v453_v29 = vadd.f32 %v452_v28, %v451_v27 }
 0x109   : > { %v454_v30 = vrot.slane %v453_v29, 1 }
 0x10b   : > { %v455_v31 = vadd.f32 %v454_v30, %v453_v29 }
 0x10d   : > { %2435 = vrcp.f32 %v455_v31 }
 0x117   : > { %v2436_v39 = vpop.eup %2435 }
 0x118   : > { %v457_v42 = vmul.f32 %v2436_v39, %v2434_v23  ;;  %v676_v23 = vmax.f32 %v674_v17, %v675_v19  ;;  %v583_v19 = vld [vmem:[%s2919_s29] sm:$0xff] }
 0x119   : > { %2238 = vmatprep.mubr.msk.f32.mxu1 %vm438_vm1, %v583_v19 }
 0x11a   : > { %2229 = vmatprep.subr.msk.mxu0 %vm2857_vm11, %v457_v42  ;;  %v677_v26 = vsub.f32 %v666_v7, %v676_v23  ;;  %v678_v27 = vsub.f32 %v667_v8, %v676_v23 }
 0x11b   : > { %2230 = vmatpush3.msk.msra.mxu0 %vm2857_vm11, %v457_v42 }
 0x11c   : > { %v679_v31 = vmul.f32 1.442695, %v677_v26  ;;  %v681_v32 = vmul.f32 1.442695, %v678_v27 }
 0x189   : > { %v427_v47 = vpop.xlane.xlu1 %426 }
 0x18a   : > { %2437 = vrcp.f32 %v427_v47 }
 0x18d   : > { %v430_v48 = vpop.xlane.xlu1 %429 }
 0x18e   : > { %2439 = vrcp.f32 %v430_v48 }
 0x191   : > { %v800_v14 = vpop.xlane.xlu1 %799 }
 0x192   : > { %v804_v18 = vsub.f32 %v2125_v55, %v800_v14 }
 0x194   : > { %v2438_v49 = vpop.eup %2437  ;;  %v806_v25 = vmul.f32 1.442695, %v804_v18 }
 0x195   : > { %v433_v50 = vmul.f32 %v2438_v49, %v2430_v20  ;;  %v2127_v20 = vld [vmem:[%s2839_s21 + $0x8] sm:$0xff] }
 0x196   : > { %2441 = vpow2.f32 %v806_v25 }
 0x197   : > { %v435_v51 = vsel %vm2849_vm9, %v433_v50, 0.0  ;;  %2443 = vpow2.f32 %v679_v31  ;;  %v584_v31 = vld [vmem:[%s2919_s29 + $0x8] sm:$0xff] }
 0x198   : > { %v2440_v52 = vpop.eup %2439  ;;  %2231 = vmatprep.mubr.msk.f32.mxu0 %vm412_vm0, %v435_v51  ;;  %2445 = vpow2.f32 %v681_v32 }
 0x199   : > { %v434_v53 = vmul.f32 %v2440_v52, %v2432_v22  ;;  %v824_v22 = vsel %vm438_vm1, %v2127_v20, -inf }
 0x19a   : > { %v825_v24 = vrot.slane %v824_v22, 4 }
 0x19b   : > { %v436_v54 = vsel %vm2853_vm10, %v434_v53, 0.0 }
 0x19c   : > { %2232 = vmatmul.mubr.msk.f32.vlgmr.msra.gmra.mrb[0].mxu0 %vm412_vm0, %v436_v54  ;;  %v826_v28 = vmax.f32 %v824_v22, %v825_v24 }
 0x19e   : > { %v827_v33 = vrot.slane %v826_v28, 2 }
 0x1a0   : > { %v828_v36 = vmax.f32 %v826_v28, %v827_v33  ;;  %v2895_v49 = vpop.eup %2441 }
 0x1a1   : > { %v2444_v50 = vpop.eup %2443 }
 0x1a2   : > { %v829_v39 = vrot.slane %v828_v36, 1  ;;  %v2446_v51 = vpop.eup %2445  ;;  %v683_v52 = vsel %vm438_vm1, %v2444_v50, 0.0 }
 0x1a3   : > { %v684_v54 = vsel %vm438_vm1, %v2446_v51, 0.0 }
 0x1a4   : > { %v830_v42 = vmax.f32 %v828_v36, %v829_v39  ;;  %v685_v56 = vadd.f32 %v684_v54, %v683_v52 }
 0x1a6   : > { %v831_v47 = vsub.f32 %v2127_v20, %v830_v42 }
 0x1a8   : > { %v832_v48 = vmul.f32 1.442695, %v831_v47 }
 0x26f   : > { %v2233_v57 = vpop.f32.mrb[0].mxu0 }
 0x270   : > { %v541_v58 = vsel %vm438_vm1, %v2233_v57, -inf  ;;  %v531_v59 = vpop.f32.mrb[1].mxu0 }
 0x271   : > { %v540_v60 = vsel %vm438_vm1, %v531_v59, -inf }
 0x272   : > { %v542_v61 = vmax.f32 %v540_v60, %v541_v58  ;;  %v686_v60 = vrot.slane %v685_v56, 4 }
 0x274   : > { %543 = vmax.xlane.f32.xlu0 %v542_v61 }
 0x278   : > { %802 = vmax.xlane.f32.xlu0 %v801_v63 }
 0x301   : > { %v544_v0 = vpop.xlane.xlu0 %543 }
 0x302   : > { %v545_v1 = vrot.slane %v544_v0, 4 }
 0x304   : > { %v546_v2 = vmax.f32 %v544_v0, %v545_v1  ;;  %v687_v0 = vadd.f32 %v686_v60, %v685_v56 }
 0x305   : > { %v803_v16 = vpop.xlane.xlu0 %802 }
 0x306   : > { %v547_v3 = vrot.slane %v546_v2, 2  ;;  %v805_v21 = vsub.f32 %v2126_v62, %v803_v16  ;;  %v810_v62 = vsel %vm412_vm0, %v2895_v49, 0.0 }
 0x308   : > { %v548_v4 = vmax.f32 %v546_v2, %v547_v3  ;;  %v808_v29 = vmul.f32 1.442695, %v805_v21  ;;  %v688_v2 = vrot.slane %v687_v0, 2 }
 0x30a   : > { %v549_v5 = vrot.slane %v548_v4, 1  ;;  %2447 = vpow2.f32 %v808_v29 }
 0x30c   : > { %v550_v6 = vmax.f32 %v548_v4, %v549_v5  ;;  %v689_v5 = vadd.f32 %v688_v2, %v687_v0 }
 0x30e   : > { %2353 = vpush %v550_v6  ;;  %v690_v9 = vrot.slane %v689_v5, 1 }
 0x310   : > { %v691_v12 = vadd.f32 %v690_v9, %v689_v5 }
 0x314   : > { %v2898_v53 = vpop.eup %2447 }
 0x315   : > { %v813_v63 = vsel %vm412_vm0, %v2898_v53, 0.0 }
 0x33f   : > { %s2354_s16 = spop %2353 }
 0x340   : > { %v552_v30 = vstv %s2354_s16 }
 0x341   : > { %v553_v34 = vsub.f32 %v531_v59, %v552_v30  ;;  %v554_v35 = vsub.f32 %v2233_v57, %v552_v30 }
 0x343   : > { %v555_v37 = vmul.f32 1.442695, %v553_v34  ;;  %v557_v38 = vmul.f32 1.442695, %v554_v35 }
 0x345   : > { %2449 = vpow2.f32 %v555_v37 }
 0x346   : > { %2451 = vpow2.f32 %v557_v38 }
 0x347   : > { %2453 = vpow2.f32 %v832_v48 }
 0x348   : > { %2455 = vrcp.f32 %v691_v12 }
 0x34f   : > { %v2901_v55 = vpop.eup %2449 }
 0x350   : > { %v2903_v57 = vpop.eup %2451  ;;  %v559_v58 = vsel %vm438_vm1, %v2901_v55, 0.0 }
 0x351   : > { %v560_v59 = vsel %vm438_vm1, %v2903_v57, 0.0  ;;  %573 = vadd.xlane.f32.xlu1 %v559_v58  ;;  %v2454_v3 = vpop.eup %2453 }
 0x352   : > { %575 = vadd.xlane.f32.xlu0 %v560_v59  ;;  %v561_v61 = vadd.f32 %v560_v59, %v559_v58  ;;  %v834_v6 = vsel %vm438_vm1, %v2454_v3, 0.0  ;;  %v2456_v20 = vpop.eup %2455 }
 0x353   : > { %v835_v8 = vrot.slane %v834_v6, 4  ;;  %v693_v21 = vmul.f32 %v2456_v20, %v2444_v50  ;;  %v694_v22 = vmul.f32 %v2456_v20, %v2446_v51 }
 0x354   : > { %v562_v1 = vrot.slane %v561_v61, 4 }
 0x355   : > { %811 = vadd.xlane.f32.xlu1 %v810_v62  ;;  %v836_v11 = vadd.f32 %v835_v8, %v834_v6  ;;  %v2311_v24 = vpack.c.bf16 %v694_v22, %v693_v21  ;;  %v2143_v6 = vld [vmem:[%s2829_s13 + $0x20] sm:$0xff] }
 0x356   : > { %v563_v4 = vadd.f32 %v562_v1, %v561_v61  ;;  %814 = vadd.xlane.f32.xlu0 %v813_v63  ;;  %v1185_v8 = vsel %vm412_vm0, %v2143_v6, -inf }
 0x357   : > { %v837_v14 = vrot.slane %v836_v11, 2  ;;  %2313 = vmatprep.subr.msk.bf16.mxu0 %vm2873_vm5, %v2311_v24 }
 0x358   : > { %v564_v7 = vrot.slane %v563_v4, 2  ;;  %2316 = vmatpush3.bf16.msk.msra.mxu0 %vm2873_vm5, %v2311_v24  ;;  %v2137_v24 = vld [vmem:[%s2813_s12 + $0x10] sm:$0xff] }
 0x359   : > { %v838_v16 = vadd.f32 %v837_v14, %v836_v11 }
 0x35a   : > { %v565_v10 = vadd.f32 %v564_v7, %v563_v4  ;;  %v2144_v7 = vld [vmem:[%s2829_s13 + $0x28] sm:$0xff] }
 0x35b   : > { %v839_v17 = vrot.slane %v838_v16, 1  ;;  %v1188_v9 = vsel %vm412_vm0, %v2144_v7, -inf }
 0x35c   : > { %v566_v13 = vrot.slane %v565_v10, 1 }
 0x35d   : > { %v840_v18 = vadd.f32 %v839_v17, %v838_v16 }
 0x35e   : > { %v567_v15 = vadd.f32 %v566_v13, %v565_v10 }
 0x360   : > { %2457 = vrcp.f32 %v567_v15 }
 0x361   : > { %2459 = vrcp.f32 %v840_v18 }
 0x36a   : > { %v2458_v23 = vpop.eup %2457 }
 0x36b   : > { %v569_v25 = vmul.f32 %v2458_v23, %v2901_v55  ;;  %v570_v26 = vmul.f32 %v2458_v23, %v2903_v57  ;;  %v2460_v29 = vpop.eup %2459 }
 0x36c   : > { %v842_v30 = vmul.f32 %v2460_v29, %v2454_v3 }
 0x36d   : > { %v2305_v28 = vpack.c.bf16 %v570_v26, %v569_v25  ;;  %v2138_v25 = vld [vmem:[%s2813_s12 + $0x18] sm:$0xff]  ;;  %v1055_v26 = vsel %vm438_vm1, %v2137_v24, -inf }
 0x36f   : > { %2307 = vmatprep.subr.msk.bf16.mxu1 %vm2929_vm2, %v2305_v28 }
 0x370   : > { %2310 = vmatpush3.bf16.msk.msra.mxu1 %vm2929_vm2, %v2305_v28  ;;  %v1056_v28 = vsel %vm438_vm1, %v2138_v25, -inf }
 0x371   : > { %2248 = vmatprep.subr.msk.mxu1 %vm2857_vm11, %v842_v30  ;;  %v1057_v29 = vmax.f32 %v1055_v26, %v1056_v28 }
 0x373   : > { %2239 = vmatmul.mubr.msk.f32.vlgmr.msra.gmra.mrb[0].mxu1 %vm438_vm1, %v584_v31 }
 0x374   : > { %2249 = vmatpush3.msk.msra.mxu1 %vm2857_vm11, %v842_v30  ;;  %v1058_v30 = vrot.slane %v1057_v29, 4 }
 0x376   : > { %v1059_v31 = vmax.f32 %v1057_v29, %v1058_v30 }
 0x3de   : > { %v574_v32 = vpop.xlane.xlu1 %573 }
 0x3df   : > { %2461 = vrcp.f32 %v574_v32  ;;  %v576_v33 = vpop.xlane.xlu0 %575 }
 0x3e0   : > { %2463 = vrcp.f32 %v576_v33  ;;  %v1060_v33 = vrot.slane %v1059_v31, 2 }
 0x3e2   : > { %v812_v34 = vpop.xlane.xlu1 %811 }
 0x3e3   : > { %2465 = vrcp.f32 %v812_v34  ;;  %v815_v35 = vpop.xlane.xlu0 %814 }
 0x3e4   : > { %2467 = vrcp.f32 %v815_v35  ;;  %v1061_v35 = vmax.f32 %v1059_v31, %v1060_v33 }
 0x3e9   : > { %v2462_v36 = vpop.eup %2461 }
 0x3ea   : > { %v2464_v37 = vpop.eup %2463  ;;  %v579_v38 = vmul.f32 %v2462_v36, %v2901_v55 }
 0x3eb   : > { %v580_v39 = vmul.f32 %v2464_v37, %v2903_v57  ;;  %v1062_v37 = vrot.slane %v1061_v35, 1 }
 0x3ec   : > { %v581_v42 = vsel %vm2861_vm12, %v579_v38, 0.0  ;;  %v2145_v38 = vld [vmem:[%s2839_s21 + $0x10] sm:$0xff] }
 0x3ed   : > { %v2466_v47 = vpop.eup %2465  ;;  %2245 = vmatprep.mubr.msk.f32.mxu0 %vm438_vm1, %v581_v42  ;;  %v582_v48 = vsel %vm2867_vm13, %v580_v39, 0.0  ;;  %v1211_v42 = vsel %vm438_vm1, %v2145_v38, -inf }
 0x3ee   : > { %v2468_v50 = vpop.eup %2467  ;;  %2246 = vmatmul.mubr.msk.f32.vlgmr.msra.gmra.mrb[2].mxu0 %vm438_vm1, %v582_v48  ;;  %v818_v51 = vmul.f32 %v2466_v47, %v2895_v49  ;;  %v1063_v47 = vmax.f32 %v1061_v35, %v1062_v37  ;;  %v1212_v48 = vrot.slane %v1211_v42, 4 }
 0x3ef   : > { %v819_v52 = vmul.f32 %v2468_v50, %v2898_v53 }
 0x3f0   : > { %v820_v54 = vsel %vm2849_vm9, %v818_v51, 0.0  ;;  %v1064_v51 = vsub.f32 %v2137_v24, %v1063_v47 }
 0x3f1   : > { %2250 = vmatprep.mubr.msk.f32.mxu1 %vm412_vm0, %v820_v54  ;;  %v821_v55 = vsel %vm2853_vm10, %v819_v52, 0.0  ;;  %v1065_v52 = vsub.f32 %v2138_v25, %v1063_v47  ;;  %v1213_v54 = vmax.f32 %v1211_v42, %v1212_v48 }
 0x3f2   : > { %2251 = vmatmul.mubr.msk.f32.vlgmr.msra.gmra.mrb[2].mxu1 %vm412_vm0, %v821_v55 }
 0x446   : > { %v2240_v56 = vpop.f32.mrb[0].mxu1 }
 0x447   : > { %v657_v57 = vpop.f32.mrb[1].mxu1 }
 0x4c1   : > { %v2247_v58 = vpop.f32.mrb[2].mxu0 }
 0x4c2   : > { %v779_v59 = vsub.f32 %v2240_v56, %v2247_v58  ;;  %v769_v60 = vpop.f32.mrb[3].mxu0  ;;  %v1068_v58 = vmul.f32 1.442695, %v1065_v52 }
 0x4c3   : > { %v778_v49 = vsub.f32 %v657_v57, %v769_v60  ;;  %v1066_v57 = vmul.f32 1.442695, %v1064_v51 }
 0x4c4   : > { %v781_v61 = vmul.f32 %v779_v59, %v779_v59  ;;  %v1214_v59 = vrot.slane %v1213_v54, 2 }
 0x4c5   : > { %v780_v53 = vmul.f32 %v778_v49, %v778_v49  ;;  %v2252_v62 = vpop.f32.mrb[2].mxu1 }
 0x4c6   : > { %v926_v63 = vsel %vm438_vm1, %v2252_v62, -inf  ;;  %v916_v0 = vpop.f32.mrb[3].mxu1  ;;  %v783_v1 = vsel %vm438_vm1, %v781_v61, 0.0  ;;  %v1215_v61 = vmax.f32 %v1213_v54, %v1214_v59 }
 0x4c7   : > { %v925_v2 = vsel %vm438_vm1, %v916_v0, -inf  ;;  %v782_v3 = vsel %vm438_vm1, %v780_v53, 0.0 }
 0x4c8   : > { %v784_v4 = vadd.f32 %v783_v1, %v782_v3  ;;  %v927_v5 = vmax.f32 %v925_v2, %v926_v63  ;;  %v1216_v1 = vrot.slane %v1215_v61, 1 }
 0x4ca   : > { %785 = vadd.xlane.f32.xlu1 %v784_v4  ;;  %928 = vmax.xlane.f32.xlu0 %v927_v5  ;;  %v1217_v2 = vmax.f32 %v1215_v61, %v1216_v1 }
 0x4cc   : > { %v1218_v3 = vsub.f32 %v2145_v38, %v1217_v2  ;;  %v2131_v38 = vld [vmem:[%s2919_s29 + $0x10] sm:$0xff] }
 0x4cd   : > { %2257 = vmatprep.mubr.msk.f32.mxu0 %vm438_vm1, %v2131_v38 }
 0x4ce   : > { %1186 = vmax.xlane.f32.xlu1 %v1185_v8  ;;  %1189 = vmax.xlane.f32.xlu0 %v1188_v9  ;;  %v1219_v4 = vmul.f32 1.442695, %v1218_v3 }
 0x557   : > { %v786_v10 = vpop.xlane.xlu1 %785  ;;  %v929_v11 = vpop.xlane.xlu0 %928 }
 0x558   : > { %v787_v12 = vrot.slane %v786_v10, 4  ;;  %v930_v13 = vrot.slane %v929_v11, 4 }
 0x55a   : > { %v788_v14 = vadd.f32 %v787_v12, %v786_v10  ;;  %v931_v15 = vmax.f32 %v929_v11, %v930_v13 }
 0x55b   : > { %v1187_v32 = vpop.xlane.xlu1 %1186  ;;  %v1190_v34 = vpop.xlane.xlu0 %1189 }
 0x55c   : > { %v789_v16 = vrot.slane %v788_v14, 2  ;;  %v932_v17 = vrot.slane %v931_v15, 2  ;;  %v1191_v36 = vsub.f32 %v2143_v6, %v1187_v32  ;;  %v1192_v39 = vsub.f32 %v2144_v7, %v1190_v34 }
 0x55e   : > { %v790_v18 = vadd.f32 %v789_v16, %v788_v14  ;;  %v933_v19 = vmax.f32 %v931_v15, %v932_v17  ;;  %v1193_v50 = vmul.f32 1.442695, %v1191_v36  ;;  %v1195_v55 = vmul.f32 1.442695, %v1192_v39 }
 0x560   : > { %v791_v20 = vrot.slane %v790_v18, 1  ;;  %v934_v21 = vrot.slane %v933_v19, 1  ;;  %2469 = vpow2.f32 %v1193_v50 }
 0x561   : > { %2471 = vpow2.f32 %v1066_v57  ;;  %v2132_v57 = vld [vmem:[%s2919_s29 + $0x18] sm:$0xff] }
 0x562   : > { %v792_v22 = vadd.f32 %v791_v20, %v790_v18  ;;  %v935_v23 = vmax.f32 %v933_v19, %v934_v21  ;;  %2473 = vpow2.f32 %v1068_v58 }
 0x563   : > { %2475 = vpow2.f32 %v1195_v55 }
 0x564   : > { %2355 = vpush %v792_v22 }
 0x565   : > { %2357 = vpush %v935_v23 }
 0x56a   : > { %v2979_v5 = vpop.eup %2469 }
 0x56b   : > { %v2472_v6 = vpop.eup %2471  ;;  %v1197_v16 = vsel %vm412_vm0, %v2979_v5, 0.0 }
 0x56c   : > { %v2474_v7 = vpop.eup %2473 }
 0x56d   : > { %v1071_v8 = vsel %vm438_vm1, %v2474_v7, 0.0 }
 0x595   : > { %s2977_s30 = spop %2355 }
 0x596   : > { %s2358_s9 = spop %2357 }
 0x597   : > { %v937_v56 = vstv %s2358_s9 }
 0x598   : > { %v938_v60 = vsub.f32 %v916_v0, %v937_v56  ;;  %v939_v49 = vsub.f32 %v2252_v62, %v937_v56  ;;  %v1070_v62 = vsel %vm438_vm1, %v2472_v6, 0.0  ;;  %v2982_v0 = vpop.eup %2475 }
 0x599   : > { %v1072_v10 = vadd.f32 %v1071_v8, %v1070_v62  ;;  %v1200_v17 = vsel %vm412_vm0, %v2982_v0, 0.0 }
 0x59a   : > { %v940_v53 = vmul.f32 1.442695, %v938_v60  ;;  %v942_v63 = vmul.f32 1.442695, %v939_v49 }
 0x59b   : > { %v1073_v14 = vrot.slane %v1072_v10, 4 }
 0x59c   : > { %2477 = vpow2.f32 %v940_v53 }
 0x59d   : > { %2479 = vpow2.f32 %v942_v63  ;;  %v1074_v18 = vadd.f32 %v1073_v14, %v1072_v10 }
 0x59e   : > { %2481 = vpow2.f32 %v1219_v4 }
 0x59f   : > { %v1075_v20 = vrot.slane %v1074_v18, 2 }
 0x5a1   : > { %v1076_v23 = vadd.f32 %v1075_v20, %v1074_v18 }
 0x5a3   : > { %v1077_v28 = vrot.slane %v1076_v23, 1 }
 0x5a5   : > { %v1078_v31 = vadd.f32 %v1077_v28, %v1076_v23 }
 0x5a6   : > { %v2985_v9 = vpop.eup %2477 }
 0x5a7   : > { %v2987_v11 = vpop.eup %2479  ;;  %v944_v12 = vsel %vm438_vm1, %v2985_v9, 0.0  ;;  %2483 = vrcp.f32 %v1078_v31 }
 0x5a8   : > { %v945_v13 = vsel %vm438_vm1, %v2987_v11, 0.0  ;;  %958 = vadd.xlane.f32.xlu1 %v944_v12  ;;  %v2482_v21 = vpop.eup %2481 }
 0x5a9   : > { %960 = vadd.xlane.f32.xlu0 %v945_v13  ;;  %v946_v15 = vadd.f32 %v945_v13, %v944_v12  ;;  %v1221_v24 = vsel %vm438_vm1, %v2482_v21, 0.0 }
 0x5aa   : > { %v1222_v26 = vrot.slane %v1221_v24, 4 }
 0x5ab   : > { %v947_v19 = vrot.slane %v946_v15, 4 }
 0x5ac   : > { %1198 = vadd.xlane.f32.xlu1 %v1197_v16  ;;  %v1223_v30 = vadd.f32 %v1222_v26, %v1221_v24  ;;  %v2161_v24 = vld [vmem:[%s2829_s13 + $0x30] sm:$0xff] }
 0x5ad   : > { %v948_v22 = vadd.f32 %v947_v19, %v946_v15  ;;  %1201 = vadd.xlane.f32.xlu0 %v1200_v17  ;;  %v1572_v26 = vsel %vm412_vm0, %v2161_v24, -inf }
 0x5ae   : > { %v1224_v33 = vrot.slane %v1223_v30, 2 }
 0x5af   : > { %v949_v25 = vrot.slane %v948_v22, 2 }
 0x5b0   : > { %v1225_v35 = vadd.f32 %v1224_v33, %v1223_v30 }
 0x5b1   : > { %v950_v29 = vadd.f32 %v949_v25, %v948_v22  ;;  %v2484_v39 = vpop.eup %2483  ;;  %v2162_v25 = vld [vmem:[%s2829_s13 + $0x38] sm:$0xff] }
 0x5b2   : > { %v1226_v36 = vrot.slane %v1225_v35, 1  ;;  %v1080_v42 = vmul.f32 %v2484_v39, %v2472_v6  ;;  %v1081_v47 = vmul.f32 %v2484_v39, %v2474_v7  ;;  %v1575_v28 = vsel %vm412_vm0, %v2162_v25, -inf }
 0x5b3   : > { %v951_v32 = vrot.slane %v950_v29, 1 }
 0x5b4   : > { %v1227_v37 = vadd.f32 %v1226_v36, %v1225_v35  ;;  %v2323_v50 = vpack.c.bf16 %v1081_v47, %v1080_v42 }
 0x5b5   : > { %v952_v34 = vadd.f32 %v951_v32, %v950_v29 }
 0x5b6   : > { %2325 = vmatprep.subr.msk.bf16.mxu1 %vm2873_vm5, %v2323_v50 }
 0x5b7   : > { %2485 = vrcp.f32 %v952_v34  ;;  %2328 = vmatpush3.bf16.msk.msra.mxu1 %vm2873_vm5, %v2323_v50  ;;  %v2155_v50 = vld [vmem:[%s2813_s12 + $0x20] sm:$0xff] }
 0x5b8   : > { %2487 = vrcp.f32 %v1227_v37 }
 0x5c1   : > { %v2486_v48 = vpop.eup %2485 }
 0x5c2   : > { %v954_v51 = vmul.f32 %v2486_v48, %v2985_v9  ;;  %v955_v52 = vmul.f32 %v2486_v48, %v2987_v11  ;;  %v2488_v55 = vpop.eup %2487 }
 0x5c3   : > { %v1229_v56 = vmul.f32 %v2488_v55, %v2482_v21 }
 0x5c4   : > { %v2317_v54 = vpack.c.bf16 %v955_v52, %v954_v51  ;;  %v2156_v51 = vld [vmem:[%s2813_s12 + $0x28] sm:$0xff]  ;;  %v1442_v52 = vsel %vm438_vm1, %v2155_v50, -inf }
 0x5c6   : > { %2319 = vmatprep.subr.msk.bf16.mxu0 %vm2929_vm2, %v2317_v54 }
 0x5c7   : > { %2322 = vmatpush3.bf16.msk.msra.mxu0 %vm2929_vm2, %v2317_v54  ;;  %v1443_v54 = vsel %vm438_vm1, %v2156_v51, -inf }
 0x5c8   : > { %2267 = vmatprep.subr.msk.mxu0 %vm2857_vm11, %v1229_v56  ;;  %v1444_v55 = vmax.f32 %v1442_v52, %v1443_v54 }
 0x5ca   : > { %2258 = vmatmul.mubr.msk.f32.vlgmr.msra.gmra.mrb[4].mxu0 %vm438_vm1, %v2132_v57 }
 0x5cb   : > { %2268 = vmatpush3.msk.msra.mxu0 %vm2857_vm11, %v1229_v56  ;;  %v1445_v56 = vrot.slane %v1444_v55, 4 }
 0x5cd   : > { %v1446_v57 = vmax.f32 %v1444_v55, %v1445_v56 }
 0x635   : > { %v959_v58 = vpop.xlane.xlu1 %958 }
 0x636   : > { %2489 = vrcp.f32 %v959_v58  ;;  %v961_v59 = vpop.xlane.xlu0 %960 }
 0x637   : > { %2491 = vrcp.f32 %v961_v59  ;;  %v1447_v59 = vrot.slane %v1446_v57, 2 }
 0x639   : > { %v1199_v60 = vpop.xlane.xlu1 %1198 }
 0x63a   : > { %2493 = vrcp.f32 %v1199_v60  ;;  %v1202_v49 = vpop.xlane.xlu0 %1201 }
 0x63b   : > { %2495 = vrcp.f32 %v1202_v49  ;;  %v1448_v49 = vmax.f32 %v1446_v57, %v1447_v59 }
 0x640   : > { %v2490_v61 = vpop.eup %2489 }
 0x641   : > { %v2492_v53 = vpop.eup %2491  ;;  %v964_v63 = vmul.f32 %v2490_v61, %v2985_v9 }
 0x642   : > { %v965_v1 = vmul.f32 %v2492_v53, %v2987_v11  ;;  %v1449_v53 = vrot.slane %v1448_v49, 1 }
 0x643   : > { %v966_v2 = vsel %vm2861_vm12, %v964_v63, 0.0  ;;  %v2163_v63 = vld [vmem:[%s2839_s21 + $0x18] sm:$0xff]  ;;  %s370_s21 = scalar_lea.vmem %s3165_s7, %s2821_s8 }
 0x644   : > { %v2494_v3 = vpop.eup %2493  ;;  %2264 = vmatprep.mubr.msk.f32.mxu1 %vm438_vm1, %v966_v2  ;;  %v967_v4 = vsel %vm2867_vm13, %v965_v1, 0.0  ;;  %v1598_v2 = vsel %vm438_vm1, %v2163_v63, -inf }
 0x645   : > { %v2496_v6 = vpop.eup %2495  ;;  %2265 = vmatmul.mubr.msk.f32.vlgmr.msra.gmra.mrb[4].mxu1 %vm438_vm1, %v967_v4  ;;  %v1205_v7 = vmul.f32 %v2494_v3, %v2979_v5  ;;  %v1450_v3 = vmax.f32 %v1448_v49, %v1449_v53  ;;  %v1599_v4 = vrot.slane %v1598_v2, 4 }
 0x646   : > { %v1206_v62 = vmul.f32 %v2496_v6, %v2982_v0 }
 0x647   : > { %v1207_v8 = vsel %vm2849_vm9, %v1205_v7, 0.0  ;;  %v1451_v7 = vsub.f32 %v2155_v50, %v1450_v3 }
 0x648   : > { %2269 = vmatprep.mubr.msk.f32.mxu0 %vm412_vm0, %v1207_v8  ;;  %v1208_v9 = vsel %vm2853_vm10, %v1206_v62, 0.0  ;;  %v1452_v62 = vsub.f32 %v2156_v51, %v1450_v3  ;;  %v1600_v8 = vmax.f32 %v1598_v2, %v1599_v4 }
 0x649   : > { %2270 = vmatmul.mubr.msk.f32.vlgmr.msra.gmra.mrb[6].mxu0 %vm412_vm0, %v1208_v9 }
 0x69d   : > { %v2259_v10 = vpop.f32.mrb[4].mxu0 }
 0x69e   : > { %v1043_v11 = vpop.f32.mrb[5].mxu0 }
 0x718   : > { %v2266_v12 = vpop.f32.mrb[4].mxu1 }
 0x719   : > { %v1166_v13 = vsub.f32 %v2259_v10, %v2266_v12  ;;  %v1156_v14 = vpop.f32.mrb[5].mxu1  ;;  %v1455_v12 = vmul.f32 1.442695, %v1452_v62 }
 0x71a   : > { %v1165_v5 = vsub.f32 %v1043_v11, %v1156_v14  ;;  %v1453_v11 = vmul.f32 1.442695, %v1451_v7 }
 0x71b   : > { %v1168_v15 = vmul.f32 %v1166_v13, %v1166_v13  ;;  %v1601_v13 = vrot.slane %v1600_v8, 2 }
 0x71c   : > { %v1167_v0 = vmul.f32 %v1165_v5, %v1165_v5  ;;  %v2271_v16 = vpop.f32.mrb[6].mxu0 }
 0x71d   : > { %v1313_v17 = vsel %vm438_vm1, %v2271_v16, -inf  ;;  %v1303_v18 = vpop.f32.mrb[7].mxu0  ;;  %v1170_v19 = vsel %vm438_vm1, %v1168_v15, 0.0  ;;  %v1602_v15 = vmax.f32 %v1600_v8, %v1601_v13 }
 0x71e   : > { %v1312_v20 = vsel %vm438_vm1, %v1303_v18, -inf  ;;  %v1169_v21 = vsel %vm438_vm1, %v1167_v0, 0.0 }
 0x71f   : > { %v1171_v22 = vadd.f32 %v1170_v19, %v1169_v21  ;;  %v1314_v23 = vmax.f32 %v1312_v20, %v1313_v17  ;;  %v1603_v19 = vrot.slane %v1602_v15, 1 }
 0x721   : > { %1172 = vadd.xlane.f32.xlu1 %v1171_v22  ;;  %1315 = vmax.xlane.f32.xlu0 %v1314_v23  ;;  %v1604_v20 = vmax.f32 %v1602_v15, %v1603_v19 }
 0x723   : > { %v1605_v21 = vsub.f32 %v2163_v63, %v1604_v20  ;;  %v2149_v63 = vld [vmem:[%s2919_s29 + $0x20] sm:$0xff] }
 0x724   : > { %2276 = vmatprep.mubr.msk.f32.mxu1 %vm438_vm1, %v2149_v63 }
 0x725   : > { %1573 = vmax.xlane.f32.xlu1 %v1572_v26  ;;  %1576 = vmax.xlane.f32.xlu0 %v1575_v28  ;;  %v1606_v22 = vmul.f32 1.442695, %v1605_v21 }
 0x7ae   : > { %v1173_v29 = vpop.xlane.xlu1 %1172  ;;  %v1316_v30 = vpop.xlane.xlu0 %1315 }
 0x7af   : > { %v1174_v31 = vrot.slane %v1173_v29, 4  ;;  %v1317_v32 = vrot.slane %v1316_v30, 4 }
 0x7b1   : > { %v1175_v33 = vadd.f32 %v1174_v31, %v1173_v29  ;;  %v1318_v34 = vmax.f32 %v1316_v30, %v1317_v32 }
 0x7b2   : > { %v1574_v58 = vpop.xlane.xlu1 %1573  ;;  %v1577_v60 = vpop.xlane.xlu0 %1576 }
 0x7b3   : > { %v1176_v35 = vrot.slane %v1175_v33, 2  ;;  %v1319_v36 = vrot.slane %v1318_v34, 2  ;;  %v1578_v61 = vsub.f32 %v2161_v24, %v1574_v58  ;;  %v1579_v1 = vsub.f32 %v2162_v25, %v1577_v60 }
 0x7b5   : > { %v1177_v37 = vadd.f32 %v1176_v35, %v1175_v33  ;;  %v1320_v38 = vmax.f32 %v1318_v34, %v1319_v36  ;;  %v1580_v6 = vmul.f32 1.442695, %v1578_v61  ;;  %v1582_v9 = vmul.f32 1.442695, %v1579_v1 }
 0x7b7   : > { %v1178_v39 = vrot.slane %v1177_v37, 1  ;;  %v1321_v42 = vrot.slane %v1320_v38, 1  ;;  %2497 = vpow2.f32 %v1580_v6 }
 0x7b8   : > { %2499 = vpow2.f32 %v1453_v11  ;;  %v2150_v11 = vld [vmem:[%s2919_s29 + $0x28] sm:$0xff] }
 0x7b9   : > { %v1179_v47 = vadd.f32 %v1178_v39, %v1177_v37  ;;  %v1322_v48 = vmax.f32 %v1320_v38, %v1321_v42  ;;  %2501 = vpow2.f32 %v1455_v12 }
 0x7ba   : > { %2503 = vpow2.f32 %v1582_v9 }
 0x7bb   : > { %2359 = vpush %v1179_v47 }
 0x7bc   : > { %2361 = vpush %v1322_v48 }
 0x7c1   : > { %v3048_v23 = vpop.eup %2497 }
 0x7c2   : > { %v2500_v24 = vpop.eup %2499  ;;  %v1584_v35 = vsel %vm412_vm0, %v3048_v23, 0.0 }
 0x7c3   : > { %v2502_v25 = vpop.eup %2501 }
 0x7c4   : > { %v1458_v26 = vsel %vm438_vm1, %v2502_v25, 0.0 }
 0x7ec   : > { %s3046_s11 = spop %2359 }
 0x7ed   : > { %s2362_s0 = spop %2361  ;;  %s1181_s1 = sadd.f32 %s3046_s11, %s2977_s30 }
 0x7ee   : > { %v1324_v10 = vstv %s2362_s0 }
 0x7ef   : > { %v1325_v14 = vsub.f32 %v1303_v18, %v1324_v10  ;;  %v1326_v5 = vsub.f32 %v2271_v16, %v1324_v10  ;;  %v1457_v16 = vsel %vm438_vm1, %v2500_v24, 0.0  ;;  %v3051_v18 = vpop.eup %2503 }
 0x7f0   : > { %v1459_v29 = vadd.f32 %v1458_v26, %v1457_v16  ;;  %v1587_v36 = vsel %vm412_vm0, %v3051_v18, 0.0 }
 0x7f1   : > { %v1327_v0 = vmul.f32 1.442695, %v1325_v14  ;;  %v1329_v17 = vmul.f32 1.442695, %v1326_v5 }
 0x7f2   : > { %v1460_v33 = vrot.slane %v1459_v29, 4 }
 0x7f3   : > { %2505 = vpow2.f32 %v1327_v0 }
 0x7f4   : > { %2507 = vpow2.f32 %v1329_v17  ;;  %v1461_v37 = vadd.f32 %v1460_v33, %v1459_v29 }
 0x7f5   : > { %2509 = vpow2.f32 %v1606_v22 }
 0x7f6   : > { %v1462_v39 = vrot.slane %v1461_v37, 2 }
 0x7f8   : > { %v1463_v48 = vadd.f32 %v1462_v39, %v1461_v37 }
 0x7fa   : > { %v1464_v54 = vrot.slane %v1463_v48, 1 }
 0x7fc   : > { %v1465_v57 = vadd.f32 %v1464_v54, %v1463_v48 }
 0x7fd   : > { %v3054_v28 = vpop.eup %2505 }
 0x7fe   : > { %v3056_v30 = vpop.eup %2507  ;;  %v1331_v31 = vsel %vm438_vm1, %v3054_v28, 0.0  ;;  %2511 = vrcp.f32 %v1465_v57 }
 0x7ff   : > { %v1332_v32 = vsel %vm438_vm1, %v3056_v30, 0.0  ;;  %1345 = vadd.xlane.f32.xlu1 %v1331_v31  ;;  %v2510_v42 = vpop.eup %2509 }
 0x800   : > { %1347 = vadd.xlane.f32.xlu0 %v1332_v32  ;;  %v1333_v34 = vadd.f32 %v1332_v32, %v1331_v31  ;;  %v1608_v50 = vsel %vm438_vm1, %v2510_v42, 0.0 }
 0x801   : > { %v1609_v52 = vrot.slane %v1608_v50, 4 }
 0x802   : > { %v1334_v38 = vrot.slane %v1333_v34, 4 }
 0x803   : > { %1585 = vadd.xlane.f32.xlu1 %v1584_v35  ;;  %v1610_v56 = vadd.f32 %v1609_v52, %v1608_v50 }
 0x804   : > { %v1335_v47 = vadd.f32 %v1334_v38, %v1333_v34  ;;  %1588 = vadd.xlane.f32.xlu0 %v1587_v36 }
 0x805   : > { %v1611_v59 = vrot.slane %v1610_v56, 2 }
 0x806   : > { %v1336_v51 = vrot.slane %v1335_v47, 2 }
 0x807   : > { %v1612_v49 = vadd.f32 %v1611_v59, %v1610_v56 }
 0x808   : > { %v1337_v55 = vadd.f32 %v1336_v51, %v1335_v47  ;;  %v2512_v1 = vpop.eup %2511 }
 0x809   : > { %v1613_v61 = vrot.slane %v1612_v49, 1  ;;  %v1467_v2 = vmul.f32 %v2512_v1, %v2500_v24  ;;  %v1468_v3 = vmul.f32 %v2512_v1, %v2502_v25 }
 0x80a   : > { %v1338_v58 = vrot.slane %v1337_v55, 1 }
 0x80b   : > { %v1614_v53 = vadd.f32 %v1613_v61, %v1612_v49  ;;  %v2335_v6 = vpack.c.bf16 %v1468_v3, %v1467_v2  ;;  %v2173_v61 = vld [vmem:[%s2813_s12 + $0x30] sm:$0xff] }
 0x80c   : > { %v1339_v60 = vadd.f32 %v1338_v58, %v1337_v55  ;;  %v1829_v63 = vsel %vm438_vm1, %v2173_v61, -inf }
 0x80d   : > { %2337 = vmatprep.subr.msk.bf16.mxu0 %vm2873_vm5, %v2335_v6 }
 0x80e   : > { %2513 = vrcp.f32 %v1339_v60  ;;  %2340 = vmatpush3.bf16.msk.msra.mxu0 %vm2873_vm5, %v2335_v6 }
 0x80f   : > { %2515 = vrcp.f32 %v1614_v53  ;;  %v2174_v53 = vld [vmem:[%s2813_s12 + $0x38] sm:$0xff] }
 0x810   : > { %v1830_v1 = vsel %vm438_vm1, %v2174_v53, -inf }
 0x811   : > { %v1831_v2 = vmax.f32 %v1829_v63, %v1830_v1 }
 0x813   : > { %v1832_v3 = vrot.slane %v1831_v2, 4 }
 0x818   : > { %v2514_v4 = vpop.eup %2513 }
 0x819   : > { %v1341_v7 = vmul.f32 %v2514_v4, %v3054_v28  ;;  %v1342_v62 = vmul.f32 %v2514_v4, %v3056_v30  ;;  %v2516_v9 = vpop.eup %2515  ;;  %v1833_v4 = vmax.f32 %v1831_v2, %v1832_v3 }
 0x81a   : > { %v1616_v10 = vmul.f32 %v2516_v9, %v2510_v42 }
 0x81b   : > { %v2329_v8 = vpack.c.bf16 %v1342_v62, %v1341_v7  ;;  %v1834_v6 = vrot.slane %v1833_v4, 2 }
 0x81d   : > { %2331 = vmatprep.subr.msk.bf16.mxu1 %vm2929_vm2, %v2329_v8  ;;  %v1835_v7 = vmax.f32 %v1833_v4, %v1834_v6 }
 0x81e   : > { %2334 = vmatpush3.bf16.msk.msra.mxu1 %vm2929_vm2, %v2329_v8 }
 0x81f   : > { %2286 = vmatprep.subr.msk.mxu1 %vm2857_vm11, %v1616_v10  ;;  %v1836_v62 = vrot.slane %v1835_v7, 1 }
 0x821   : > { %2277 = vmatmul.mubr.msk.f32.vlgmr.msra.gmra.mrb[6].mxu1 %vm438_vm1, %v2150_v11  ;;  %v1837_v8 = vmax.f32 %v1835_v7, %v1836_v62 }
 0x822   : > { %2287 = vmatpush3.msk.msra.mxu1 %vm2857_vm11, %v1616_v10 }
 0x823   : > { %v1838_v9 = vsub.f32 %v2173_v61, %v1837_v8  ;;  %v1839_v10 = vsub.f32 %v2174_v53, %v1837_v8 }
 0x88c   : > { %v1346_v12 = vpop.xlane.xlu1 %1345 }
 0x88d   : > { %2517 = vrcp.f32 %v1346_v12  ;;  %v1348_v13 = vpop.xlane.xlu0 %1347  ;;  %v1840_v12 = vmul.f32 1.442695, %v1838_v9 }
 0x88e   : > { %2519 = vrcp.f32 %v1348_v13  ;;  %v1842_v13 = vmul.f32 1.442695, %v1839_v10 }
 0x890   : > { %v1586_v14 = vpop.xlane.xlu1 %1585 }
 0x891   : > { %2521 = vrcp.f32 %v1586_v14  ;;  %v1589_v5 = vpop.xlane.xlu0 %1588 }
 0x892   : > { %2523 = vrcp.f32 %v1589_v5 }
 0x893   : > { %2525 = vpow2.f32 %v1840_v12 }
 0x894   : > { %2527 = vpow2.f32 %v1842_v13 }
 0x897   : > { %v2518_v15 = vpop.eup %2517 }
 0x898   : > { %v2520_v0 = vpop.eup %2519  ;;  %v1351_v17 = vmul.f32 %v2518_v15, %v3054_v28 }
 0x899   : > { %v1352_v19 = vmul.f32 %v2520_v0, %v3056_v30 }
 0x89a   : > { %v1353_v20 = vsel %vm2861_vm12, %v1351_v17, 0.0 }
 0x89b   : > { %v2522_v21 = vpop.eup %2521  ;;  %2283 = vmatprep.mubr.msk.f32.mxu0 %vm438_vm1, %v1353_v20  ;;  %v1354_v43 = vsel %vm2867_vm13, %v1352_v19, 0.0 }
 0x89c   : > { %v2524_v22 = vpop.eup %2523  ;;  %2284 = vmatmul.mubr.msk.f32.vlgmr.msra.gmra.mrb[8].mxu0 %vm438_vm1, %v1354_v43  ;;  %v1592_v24 = vmul.f32 %v2522_v21, %v3048_v23 }
 0x89d   : > { %v1593_v25 = vmul.f32 %v2524_v22, %v3051_v18  ;;  %v2526_v17 = vpop.eup %2525 }
 0x89e   : > { %v1594_v16 = vsel %vm2849_vm9, %v1592_v24, 0.0  ;;  %v2528_v19 = vpop.eup %2527  ;;  %v1844_v20 = vsel %vm438_vm1, %v2526_v17, 0.0 }
 0x89f   : > { %2288 = vmatprep.mubr.msk.f32.mxu1 %vm412_vm0, %v1594_v16  ;;  %v1595_v26 = vsel %vm2853_vm10, %v1593_v25, 0.0  ;;  %v1845_v21 = vsel %vm438_vm1, %v2528_v19, 0.0 }
 0x8a0   : > { %2289 = vmatmul.mubr.msk.f32.vlgmr.msra.gmra.mrb[8].mxu1 %vm412_vm0, %v1595_v26  ;;  %v1846_v22 = vadd.f32 %v1845_v21, %v1844_v20  ;;  %vm1957_vm0 = vcmask 0  }
 0x8a2   : > { %v1847_v26 = vrot.slane %v1846_v22, 4 }
 0x8f4   : > { %v2278_v28 = vpop.f32.mrb[6].mxu1 }
 0x8f5   : > { %v1430_v29 = vpop.f32.mrb[7].mxu1 }
 0x96f   : > { %v2285_v30 = vpop.f32.mrb[8].mxu0 }
 0x970   : > { %v1553_v31 = vsub.f32 %v2278_v28, %v2285_v30  ;;  %v1543_v32 = vpop.f32.mrb[9].mxu0 }
 0x971   : > { %v1552_v33 = vsub.f32 %v1430_v29, %v1543_v32  ;;  %v1848_v29 = vadd.f32 %v1847_v26, %v1846_v22 }
 0x972   : > { %v1555_v34 = vmul.f32 %v1553_v31, %v1553_v31 }
 0x973   : > { %v1554_v23 = vmul.f32 %v1552_v33, %v1552_v33  ;;  %v2290_v35 = vpop.f32.mrb[8].mxu1  ;;  %v1849_v31 = vrot.slane %v1848_v29, 2 }
 0x974   : > { %v1700_v18 = vsel %vm438_vm1, %v2290_v35, -inf  ;;  %v1690_v40 = vpop.f32.mrb[9].mxu1  ;;  %v1557_v36 = vsel %vm438_vm1, %v1555_v34, 0.0 }
 0x975   : > { %v1699_v37 = vsel %vm438_vm1, %v1690_v40, -inf  ;;  %v1556_v41 = vsel %vm438_vm1, %v1554_v23, 0.0  ;;  %v1850_v33 = vadd.f32 %v1849_v31, %v1848_v29 }
 0x976   : > { %v1558_v38 = vadd.f32 %v1557_v36, %v1556_v41  ;;  %v1701_v39 = vmax.f32 %v1699_v37, %v1700_v18  ;;  %v2167_v37 = vld [vmem:[%s2919_s29 + $0x30] sm:$0xff] }
 0x977   : > { %v1851_v23 = vrot.slane %v1850_v33, 1  ;;  %2295 = vmatprep.mubr.msk.f32.mxu0 %vm438_vm1, %v2167_v37 }
 0x978   : > { %1559 = vadd.xlane.f32.xlu1 %v1558_v38  ;;  %1702 = vmax.xlane.f32.xlu0 %v1701_v39 }
 0x979   : > { %v1852_v18 = vadd.f32 %v1851_v23, %v1850_v33 }
 0xa05   : > { %v1560_v42 = vpop.xlane.xlu1 %1559  ;;  %v1703_v47 = vpop.xlane.xlu0 %1702 }
 0xa06   : > { %v1561_v48 = vrot.slane %v1560_v42, 4  ;;  %v1704_v50 = vrot.slane %v1703_v47, 4 }
 0xa08   : > { %v1562_v51 = vadd.f32 %v1561_v48, %v1560_v42  ;;  %v1705_v52 = vmax.f32 %v1703_v47, %v1704_v50 }
 0xa0a   : > { %v1563_v54 = vrot.slane %v1562_v51, 2  ;;  %v1706_v55 = vrot.slane %v1705_v52, 2 }
 0xa0c   : > { %v1564_v56 = vadd.f32 %v1563_v54, %v1562_v51  ;;  %v1707_v57 = vmax.f32 %v1705_v52, %v1706_v55  ;;  %v2168_v52 = vld [vmem:[%s2919_s29 + $0x38] sm:$0xff] }
 0xa0e   : > { %v1565_v58 = vrot.slane %v1564_v56, 1  ;;  %v1708_v59 = vrot.slane %v1707_v57, 1 }
 0xa10   : > { %v1566_v60 = vadd.f32 %v1565_v58, %v1564_v56  ;;  %v1709_v49 = vmax.f32 %v1707_v57, %v1708_v59 }
 0xa12   : > { %2363 = vpush %v1566_v60 }
 0xa13   : > { %2365 = vpush %v1709_v49 }
 0xa43   : > { %s2364_s10 = spop %2363 }
 0xa44   : > { %s3111_s13 = sadd.f32 %s2364_s10, %s1181_s1  ;;  %s2366_s24 = spop %2365 }
 0xa45   : > { %v1711_v11 = vstv %s2366_s24 }
 0xa46   : > { %v1712_v14 = vsub.f32 %v1690_v40, %v1711_v11  ;;  %v1713_v5 = vsub.f32 %v2290_v35, %v1711_v11 }
 0xa48   : > { %v1714_v15 = vmul.f32 1.442695, %v1712_v14  ;;  %v1716_v0 = vmul.f32 1.442695, %v1713_v5 }
 0xa4a   : > { %2529 = vpow2.f32 %v1714_v15 }
 0xa4b   : > { %2531 = vpow2.f32 %v1716_v0 }
 0xa4c   : > { %2533 = vrcp.f32 %v1852_v18 }
 0xa54   : > { %v2530_v43 = vpop.eup %2529 }
 0xa55   : > { %v2532_v24 = vpop.eup %2531  ;;  %v1718_v25 = vsel %vm438_vm1, %v2530_v43, 0.0 }
 0xa56   : > { %v1719_v16 = vsel %vm438_vm1, %v2532_v24, 0.0  ;;  %1732 = vadd.xlane.f32.xlu1 %v1718_v25  ;;  %v2534_v41 = vpop.eup %2533 }
 0xa57   : > { %1734 = vadd.xlane.f32.xlu0 %v1719_v16  ;;  %v1720_v28 = vadd.f32 %v1719_v16, %v1718_v25  ;;  %v1854_v38 = vmul.f32 %v2534_v41, %v2526_v17  ;;  %v1855_v39 = vmul.f32 %v2534_v41, %v2528_v19 }
 0xa59   : > { %v1721_v30 = vrot.slane %v1720_v28, 4  ;;  %v2347_v47 = vpack.c.bf16 %v1855_v39, %v1854_v38 }
 0xa5b   : > { %v1722_v32 = vadd.f32 %v1721_v30, %v1720_v28  ;;  %2349 = vmatprep.subr.msk.bf16.mxu1 %vm2873_vm5, %v2347_v47 }
 0xa5c   : > { %2352 = vmatpush3.bf16.msk.msra.mxu1 %vm2873_vm5, %v2347_v47 }
 0xa5d   : > { %v1723_v34 = vrot.slane %v1722_v32, 2 }
 0xa5f   : > { %v1724_v35 = vadd.f32 %v1723_v34, %v1722_v32 }
 0xa61   : > { %v1725_v40 = vrot.slane %v1724_v35, 1 }
 0xa63   : > { %v1726_v36 = vadd.f32 %v1725_v40, %v1724_v35 }
 0xa65   : > { %2535 = vrcp.f32 %v1726_v36 }
 0xa6f   : > { %v2536_v42 = vpop.eup %2535 }
 0xa70   : > { %v1728_v48 = vmul.f32 %v2536_v42, %v2530_v43  ;;  %v1729_v50 = vmul.f32 %v2536_v42, %v2532_v24 }
 0xa72   : > { %v2341_v51 = vpack.c.bf16 %v1729_v50, %v1728_v48 }
 0xa74   : > { %2343 = vmatprep.subr.msk.bf16.mxu0 %vm2929_vm2, %v2341_v51 }
 0xa75   : > { %2346 = vmatpush3.bf16.msk.msra.mxu0 %vm2929_vm2, %v2341_v51 }
 0xa78   : > { %2296 = vmatmul.mubr.msk.f32.vlgmr.msra.gmra.mrb[10].mxu0 %vm438_vm1, %v2168_v52 }
 0xae3   : > { %v1733_v54 = vpop.xlane.xlu1 %1732 }
 0xae4   : > { %v1735_v55 = vpop.xlane.xlu0 %1734  ;;  %2537 = vrcp.f32 %v1733_v54 }
 0xae5   : > { %2539 = vrcp.f32 %v1735_v55 }
 0xaee   : > { %v2538_v56 = vpop.eup %2537 }
 0xaef   : > { %v2540_v57 = vpop.eup %2539  ;;  %v1738_v58 = vmul.f32 %v2538_v56, %v2530_v43 }
 0xaf0   : > { %v1739_v59 = vmul.f32 %v2540_v57, %v2532_v24 }
 0xaf1   : > { %v1740_v46 = vsel %vm2861_vm12, %v1738_v58, 0.0 }
 0xaf2   : > { %2302 = vmatprep.mubr.msk.f32.mxu1 %vm438_vm1, %v1740_v46  ;;  %v1741_v27 = vsel %vm2867_vm13, %v1739_v59, 0.0 }
 0xaf3   : > { %2303 = vmatmul.mubr.msk.f32.vlgmr.msra.gmra.mrb[10].mxu1 %vm438_vm1, %v1741_v27 }
 0xb4b   : > { %v2297_v60 = vpop.f32.mrb[10].mxu0 }
 0xb4c   : > { %v1817_v49 = vpop.f32.mrb[11].mxu0 }
 0xbc6   : > { %v2304_v61 = vpop.f32.mrb[10].mxu1 }
 0xbc7   : > { %v1940_v53 = vsub.f32 %v2297_v60, %v2304_v61  ;;  %v1930_v63 = vpop.f32.mrb[11].mxu1 }
 0xbc8   : > { %v1939_v1 = vsub.f32 %v1817_v49, %v1930_v63 }
 0xbc9   : > { %v1942_v2 = vmul.f32 %v1940_v53, %v1940_v53 }
 0xbca   : > { %v1941_v3 = vmul.f32 %v1939_v1, %v1939_v1 }
 0xbcb   : > { %v1944_v44 = vsel %vm438_vm1, %v1942_v2, 0.0 }
 0xbcc   : > { %v1943_v4 = vsel %vm438_vm1, %v1941_v3, 0.0 }
 0xbcd   : > { %v1945_v6 = vadd.f32 %v1944_v44, %v1943_v4 }
 0xbcf   : > { %1946 = vadd.xlane.f32.xlu1 %v1945_v6 }
 0xc5c   : > { %v1947_v45 = vpop.xlane.xlu1 %1946 }
 0xc5d   : > { %v1948_v7 = vrot.slane %v1947_v45, 4 }
 0xc5f   : > { %v1949_v62 = vadd.f32 %v1948_v7, %v1947_v45 }
 0xc61   : > { %v1950_v8 = vrot.slane %v1949_v62, 2 }
 0xc63   : > { %v1951_v9 = vadd.f32 %v1950_v8, %v1949_v62 }
 0xc65   : > { %v1952_v10 = vrot.slane %v1951_v9, 1 }
 0xc67   : > { %v1953_v11 = vadd.f32 %v1952_v10, %v1951_v9 }
 0xc69   : > { %2367 = vpush %v1953_v11 }
 0xc9a   : > { %s2368_s12 = spop %2367 }
 0xc9b   : > { %s1955_s22 = sadd.f32 %s2368_s12, %s3111_s13 }
 0xc9d   : > { %v1956_v12 = vstv %s1955_s22 }
 0xc9e   : > { %1958 = vst.msk [vmem:[%s370_s21] sm:$0x1] %vm1957_vm0, %v1956_v12 }
 0xc9f PF: > { %s34_s18 = sadd.s32 1, %s2659_s18   ;;  %s3185_s14 = smov %s2643_s15 }
 0xca0   : > { %p31_p8 = scmp.ge.s32.totalorder %s34_s18, 4   ;;  %s3186_s15 = smov %s2647_s2 }
 0xca1   : > { %s3187_s2 = smov %s2765_s25  ;;  %s3188_s16 = smov %s2655_s17 }
 0xca2   : > { %s3189_s17 = smov %s3191_s20  ;;  %33 = sbr.rel (!%p31_p8) target bundleno = 39 (0x27), region = 97 }
 0xca9   :  { %1982 = vsyncpa [#allocation7], 1 }
 0xcaa   :  { %1984 = vsyncpa [#allocation7 + $0x1], 1 }

</bundles_post_ra>
